<compile_context>
chip_gen: v6e
topology: v6e:2x2x1
jax: 0.10.0
libtpu: 0.0.40
codegen_flags: <defaults>
</compile_context>

<pallas_src>
import functools

import jax
import jax.numpy as jnp
from jax.experimental import pallas as pl
from jax.experimental.pallas import tpu as pltpu

SIGMA = 10.0
SIGMA_COLOR = -1.0 / (2.0 * SIGMA * SIGMA)

# 12 unique (dy, dx) displacements; each occurs twice in the torch module
# (w1/w2, w3/w4, ... pairs are numerically identical), so every term below
# carries a factor of 2 folded into its mask scale.
_SHIFTS = ((1, 0), (0, 1), (1, 1), (1, -1),
           (2, 0), (0, 2), (2, 1), (2, -1),
           (1, 2), (1, -2), (2, 2), (2, -2))


def _smooth_loss_kernel(mask_ref, z_ref, o_ref, *, C, W):
    """One fused step: all batches, all 12 shifts.

    z_ref:    (2C, B*H*W)  rows [0, C) = input channels, rows [C, 2C) = output
                           channels; lanes = batch-major flattened (h, w).
    mask_ref: (12, B*H*W)  per-shift validity mask, mean factor pre-folded.
    o_ref:    (1, 128)     broadcast scalar result (lane-dense, unmasked vst).
    """
    z = z_ref[...].astype(jnp.float32)                      # (2C, BHW)
    acc = jnp.zeros((1, z.shape[1]), jnp.float32)

    for i, (dy, dx) in enumerate(_SHIFTS):
        s = dy * W + dx                                     # flat lane shift (> 0)
        # One XLU roll + one VALU subtract per shift for the stacked (x | y).
        d = pltpu.roll(z, s, axis=1) - z                    # (2C, BHW)
        sq = jnp.sum(d[:C] * d[:C], axis=0, keepdims=True)  # (1, BHW)
        l1 = jnp.sum(jnp.abs(d[C:]), axis=0, keepdims=True)  # (1, BHW)
        # TODO(synk): if a bundle dump at large H*W shows the XLU saturating,
        # offload these two channel reductions to the idle MXU with a
        # ones((1, C)) dot (preferred_element_type=f32).
        w = jnp.exp(sq * jnp.float32(SIGMA_COLOR))          # EUP slot
        acc = acc + mask_ref[pl.ds(i, 1), :] * w * l1       # wrapped lanes masked to 0

    # One cross-lane reduction total; store as a full unmasked (1, 128) row.
    o_ref[...] = jnp.broadcast_to(jnp.sum(acc), o_ref.shape)


@jax.jit
def smooth_loss(x, y):
    B, C, H, W = x.shape
    assert H > 2 and W > 2, "SmoothLoss requires H > 2 and W > 2"
    HW = H * W

    # Layout plumbing only (no compute hoisted out of the kernel): stack the
    # input and output channels on sublanes, batch-major spatial on lanes.
    z = jnp.concatenate([x.reshape(B, C, HW), y.reshape(B, C, HW)], axis=1)
    z = jnp.transpose(z, (1, 0, 2)).reshape(2 * C, B * HW)        # (2C, B*HW)

    # Precompute the 12 scaled validity masks. With pltpu.roll's jnp.roll
    # convention (out[p] = in[(p - s) % N]) the partner of flat (h, w) is
    # (h - dy, w - dx); valid iff h >= dy and 0 <= w - dx < W. Every valid
    # position has (h*W + w) >= s, so cross-batch / wrap-around lanes are
    # always masked out.
    hh = jnp.arange(H, dtype=jnp.int32)[:, None]
    ww = jnp.arange(W, dtype=jnp.int32)[None, :]
    rows = []
    for dy, dx in _SHIFTS:
        valid = (hh >= dy) & (ww - dx >= 0) & (ww - dx < W)
        scale = 2.0 / (B * (H - dy) * (W - abs(dx)))   # 2 = torch duplicate pair
        rows.append(jnp.where(valid, jnp.float32(scale),
                              jnp.float32(0.0)).reshape(HW))
    masks = jnp.tile(jnp.stack(rows, axis=0), (1, B))             # (12, B*HW)

    kernel = functools.partial(_smooth_loss_kernel, C=C, W=W)

    out = pl.pallas_call(
        kernel,
        out_shape=jax.ShapeDtypeStruct((1, 128), jnp.float32),
        in_specs=[
            pl.BlockSpec(memory_space=pltpu.MemorySpace.VMEM),    # mask table
            pl.BlockSpec(memory_space=pltpu.MemorySpace.VMEM),    # stacked x|y
        ],
        out_specs=pl.BlockSpec(memory_space=pltpu.MemorySpace.VMEM),
    )(masks, z)

    return out[0, 0]


def smooth_loss_ref(x, y):
    """Pure-JAX reference mirroring the PyTorch forward (sanity check)."""
    x = x.astype(jnp.float32)
    y = y.astype(jnp.float32)
    B, C, H, W = x.shape
    total = jnp.float32(0.0)
    for dy, dx in _SHIFTS:
        ha, hb = slice(dy, H), slice(0, H - dy)
        if dx >= 0:
            wa, wb = slice(dx, W), slice(0, W - dx)
        else:
            wa, wb = slice(0, W + dx), slice(-dx, W)
        din = x[:, :, ha, wa] - x[:, :, hb, wb]
        w = jnp.exp(jnp.sum(din * din, axis=1, keepdims=True) * SIGMA_COLOR)
        dout = y[:, :, ha, wa] - y[:, :, hb, wb]
        l1 = jnp.sum(jnp.abs(dout), axis=1, keepdims=True)
        total = total + 2.0 * jnp.mean(w * l1)
    return total


if __name__ == "__main__":
    key = jax.random.PRNGKey(0)
    k1, k2 = jax.random.split(key)
    # input is an RGB-like image (3 channels), output a same-shape map.
    x = jax.random.uniform(k1, (2, 3, 16, 16), dtype=jnp.float32)
    y = jax.random.uniform(k2, (2, 3, 16, 16), dtype=jnp.float32)

    loss = smooth_loss(x, y)
    jax.block_until_ready(loss)

    ref = smooth_loss_ref(x, y)
    assert jnp.allclose(loss, ref, rtol=1e-5, atol=1e-5), (loss, ref)

    print("KERNEL_OK")
</pallas_src>

<mosaic_0001>
module attributes {stable_mosaic.version = 11 : i64} {
  func.func @_smooth_loss_kernel(%arg0: memref<12x512xf32, #tpu.memory_space<vmem>>, %arg1: memref<6x512xf32, #tpu.memory_space<vmem>>, %arg2: memref<1x128xf32, #tpu.memory_space<vmem>>) attributes {dimension_semantics = [], scalar_prefetch = 0 : i64, scratch_operands = 0 : i64, tpu.core_type = #tpu.core_type<tc>} {
    %c0 = arith.constant 0 : index
    %c0_0 = arith.constant 0 : index
    %0 = vector.load %arg1[%c0, %c0_0] : memref<6x512xf32, #tpu.memory_space<vmem>>, vector<6x512xf32>
    %cst = arith.constant 0.000000e+00 : f32
    %1 = vector.broadcast %cst : f32 to vector<1x512xf32>
    %c16_i32 = arith.constant 16 : i32
    %2 = tpu.dynamic_rotate %0 by %c16_i32 dim 1 : vector<6x512xf32>, i32 -> vector<6x512xf32>
    %3 = arith.subf %2, %0 : vector<6x512xf32>
    %4 = vector.extract_strided_slice %3 {offsets = [0, 0], sizes = [3, 512], strides = [1, 1]} : vector<6x512xf32> to vector<3x512xf32>
    %5 = vector.extract_strided_slice %3 {offsets = [0, 0], sizes = [3, 512], strides = [1, 1]} : vector<6x512xf32> to vector<3x512xf32>
    %6 = arith.mulf %4, %5 : vector<3x512xf32>
    %cst_1 = arith.constant dense<0.000000e+00> : vector<512xf32>
    %7 = vector.multi_reduction <add>, %6, %cst_1 [0] : vector<3x512xf32> to vector<512xf32>
    %8 = vector.shape_cast %7 : vector<512xf32> to vector<1x512xf32>
    %9 = vector.extract_strided_slice %3 {offsets = [3, 0], sizes = [3, 512], strides = [1, 1]} : vector<6x512xf32> to vector<3x512xf32>
    %10 = math.absf %9 : vector<3x512xf32>
    %cst_2 = arith.constant dense<0.000000e+00> : vector<512xf32>
    %11 = vector.multi_reduction <add>, %10, %cst_2 [0] : vector<3x512xf32> to vector<512xf32>
    %12 = vector.shape_cast %11 : vector<512xf32> to vector<1x512xf32>
    %cst_3 = arith.constant -5.000000e-03 : f32
    %13 = vector.broadcast %cst_3 : f32 to vector<1x512xf32>
    %14 = arith.mulf %8, %13 : vector<1x512xf32>
    %15 = math.exp %14 : vector<1x512xf32>
    %c0_4 = arith.constant 0 : index
    %c0_5 = arith.constant 0 : index
    %16 = vector.load %arg0[%c0_4, %c0_5] : memref<12x512xf32, #tpu.memory_space<vmem>>, vector<1x512xf32>
    %17 = arith.mulf %16, %15 : vector<1x512xf32>
    %18 = arith.mulf %17, %12 : vector<1x512xf32>
    %19 = arith.addf %1, %18 : vector<1x512xf32>
    %c1_i32 = arith.constant 1 : i32
    %20 = tpu.dynamic_rotate %0 by %c1_i32 dim 1 : vector<6x512xf32>, i32 -> vector<6x512xf32>
    %21 = arith.subf %20, %0 : vector<6x512xf32>
    %22 = vector.extract_strided_slice %21 {offsets = [0, 0], sizes = [3, 512], strides = [1, 1]} : vector<6x512xf32> to vector<3x512xf32>
    %23 = vector.extract_strided_slice %21 {offsets = [0, 0], sizes = [3, 512], strides = [1, 1]} : vector<6x512xf32> to vector<3x512xf32>
    %24 = arith.mulf %22, %23 : vector<3x512xf32>
    %cst_6 = arith.constant dense<0.000000e+00> : vector<512xf32>
    %25 = vector.multi_reduction <add>, %24, %cst_6 [0] : vector<3x512xf32> to vector<512xf32>
    %26 = vector.shape_cast %25 : vector<512xf32> to vector<1x512xf32>
    %27 = vector.extract_strided_slice %21 {offsets = [3, 0], sizes = [3, 512], strides = [1, 1]} : vector<6x512xf32> to vector<3x512xf32>
    %28 = math.absf %27 : vector<3x512xf32>
    %cst_7 = arith.constant dense<0.000000e+00> : vector<512xf32>
    %29 = vector.multi_reduction <add>, %28, %cst_7 [0] : vector<3x512xf32> to vector<512xf32>
    %30 = vector.shape_cast %29 : vector<512xf32> to vector<1x512xf32>
    %cst_8 = arith.constant -5.000000e-03 : f32
    %31 = vector.broadcast %cst_8 : f32 to vector<1x512xf32>
    %32 = arith.mulf %26, %31 : vector<1x512xf32>
    %33 = math.exp %32 : vector<1x512xf32>
    %c1 = arith.constant 1 : index
    %c0_9 = arith.constant 0 : index
    %34 = vector.load %arg0[%c1, %c0_9] : memref<12x512xf32, #tpu.memory_space<vmem>>, vector<1x512xf32>
    %35 = arith.mulf %34, %33 : vector<1x512xf32>
    %36 = arith.mulf %35, %30 : vector<1x512xf32>
    %37 = arith.addf %19, %36 : vector<1x512xf32>
    %c17_i32 = arith.constant 17 : i32
    %38 = tpu.dynamic_rotate %0 by %c17_i32 dim 1 : vector<6x512xf32>, i32 -> vector<6x512xf32>
    %39 = arith.subf %38, %0 : vector<6x512xf32>
    %40 = vector.extract_strided_slice %39 {offsets = [0, 0], sizes = [3, 512], strides = [1, 1]} : vector<6x512xf32> to vector<3x512xf32>
    %41 = vector.extract_strided_slice %39 {offsets = [0, 0], sizes = [3, 512], strides = [1, 1]} : vector<6x512xf32> to vector<3x512xf32>
    %42 = arith.mulf %40, %41 : vector<3x512xf32>
    %cst_10 = arith.constant dense<0.000000e+00> : vector<512xf32>
    %43 = vector.multi_reduction <add>, %42, %cst_10 [0] : vector<3x512xf32> to vector<512xf32>
    %44 = vector.shape_cast %43 : vector<512xf32> to vector<1x512xf32>
    %45 = vector.extract_strided_slice %39 {offsets = [3, 0], sizes = [3, 512], strides = [1, 1]} : vector<6x512xf32> to vector<3x512xf32>
    %46 = math.absf %45 : vector<3x512xf32>
    %cst_11 = arith.constant dense<0.000000e+00> : vector<512xf32>
    %47 = vector.multi_reduction <add>, %46, %cst_11 [0] : vector<3x512xf32> to vector<512xf32>
    %48 = vector.shape_cast %47 : vector<512xf32> to vector<1x512xf32>
    %cst_12 = arith.constant -5.000000e-03 : f32
    %49 = vector.broadcast %cst_12 : f32 to vector<1x512xf32>
    %50 = arith.mulf %44, %49 : vector<1x512xf32>
    %51 = math.exp %50 : vector<1x512xf32>
    %c2 = arith.constant 2 : index
    %c0_13 = arith.constant 0 : index
    %52 = vector.load %arg0[%c2, %c0_13] : memref<12x512xf32, #tpu.memory_space<vmem>>, vector<1x512xf32>
    %53 = arith.mulf %52, %51 : vector<1x512xf32>
    %54 = arith.mulf %53, %48 : vector<1x512xf32>
    %55 = arith.addf %37, %54 : vector<1x512xf32>
    %c15_i32 = arith.constant 15 : i32
    %56 = tpu.dynamic_rotate %0 by %c15_i32 dim 1 : vector<6x512xf32>, i32 -> vector<6x512xf32>
    %57 = arith.subf %56, %0 : vector<6x512xf32>
    %58 = vector.extract_strided_slice %57 {offsets = [0, 0], sizes = [3, 512], strides = [1, 1]} : vector<6x512xf32> to vector<3x512xf32>
    %59 = vector.extract_strided_slice %57 {offsets = [0, 0], sizes = [3, 512], strides = [1, 1]} : vector<6x512xf32> to vector<3x512xf32>
    %60 = arith.mulf %58, %59 : vector<3x512xf32>
    %cst_14 = arith.constant dense<0.000000e+00> : vector<512xf32>
    %61 = vector.multi_reduction <add>, %60, %cst_14 [0] : vector<3x512xf32> to vector<512xf32>
    %62 = vector.shape_cast %61 : vector<512xf32> to vector<1x512xf32>
    %63 = vector.extract_strided_slice %57 {offsets = [3, 0], sizes = [3, 512], strides = [1, 1]} : vector<6x512xf32> to vector<3x512xf32>
    %64 = math.absf %63 : vector<3x512xf32>
    %cst_15 = arith.constant dense<0.000000e+00> : vector<512xf32>
    %65 = vector.multi_reduction <add>, %64, %cst_15 [0] : vector<3x512xf32> to vector<512xf32>
    %66 = vector.shape_cast %65 : vector<512xf32> to vector<1x512xf32>
    %cst_16 = arith.constant -5.000000e-03 : f32
    %67 = vector.broadcast %cst_16 : f32 to vector<1x512xf32>
    %68 = arith.mulf %62, %67 : vector<1x512xf32>
    %69 = math.exp %68 : vector<1x512xf32>
    %c3 = arith.constant 3 : index
    %c0_17 = arith.constant 0 : index
    %70 = vector.load %arg0[%c3, %c0_17] : memref<12x512xf32, #tpu.memory_space<vmem>>, vector<1x512xf32>
    %71 = arith.mulf %70, %69 : vector<1x512xf32>
    %72 = arith.mulf %71, %66 : vector<1x512xf32>
    %73 = arith.addf %55, %72 : vector<1x512xf32>
    %c32_i32 = arith.constant 32 : i32
    %74 = tpu.dynamic_rotate %0 by %c32_i32 dim 1 : vector<6x512xf32>, i32 -> vector<6x512xf32>
    %75 = arith.subf %74, %0 : vector<6x512xf32>
    %76 = vector.extract_strided_slice %75 {offsets = [0, 0], sizes = [3, 512], strides = [1, 1]} : vector<6x512xf32> to vector<3x512xf32>
    %77 = vector.extract_strided_slice %75 {offsets = [0, 0], sizes = [3, 512], strides = [1, 1]} : vector<6x512xf32> to vector<3x512xf32>
    %78 = arith.mulf %76, %77 : vector<3x512xf32>
    %cst_18 = arith.constant dense<0.000000e+00> : vector<512xf32>
    %79 = vector.multi_reduction <add>, %78, %cst_18 [0] : vector<3x512xf32> to vector<512xf32>
    %80 = vector.shape_cast %79 : vector<512xf32> to vector<1x512xf32>
    %81 = vector.extract_strided_slice %75 {offsets = [3, 0], sizes = [3, 512], strides = [1, 1]} : vector<6x512xf32> to vector<3x512xf32>
    %82 = math.absf %81 : vector<3x512xf32>
    %cst_19 = arith.constant dense<0.000000e+00> : vector<512xf32>
    %83 = vector.multi_reduction <add>, %82, %cst_19 [0] : vector<3x512xf32> to vector<512xf32>
    %84 = vector.shape_cast %83 : vector<512xf32> to vector<1x512xf32>
    %cst_20 = arith.constant -5.000000e-03 : f32
    %85 = vector.broadcast %cst_20 : f32 to vector<1x512xf32>
    %86 = arith.mulf %80, %85 : vector<1x512xf32>
    %87 = math.exp %86 : vector<1x512xf32>
    %c4 = arith.constant 4 : index
    %c0_21 = arith.constant 0 : index
    %88 = vector.load %arg0[%c4, %c0_21] : memref<12x512xf32, #tpu.memory_space<vmem>>, vector<1x512xf32>
    %89 = arith.mulf %88, %87 : vector<1x512xf32>
    %90 = arith.mulf %89, %84 : vector<1x512xf32>
    %91 = arith.addf %73, %90 : vector<1x512xf32>
    %c2_i32 = arith.constant 2 : i32
    %92 = tpu.dynamic_rotate %0 by %c2_i32 dim 1 : vector<6x512xf32>, i32 -> vector<6x512xf32>
    %93 = arith.subf %92, %0 : vector<6x512xf32>
    %94 = vector.extract_strided_slice %93 {offsets = [0, 0], sizes = [3, 512], strides = [1, 1]} : vector<6x512xf32> to vector<3x512xf32>
    %95 = vector.extract_strided_slice %93 {offsets = [0, 0], sizes = [3, 512], strides = [1, 1]} : vector<6x512xf32> to vector<3x512xf32>
    %96 = arith.mulf %94, %95 : vector<3x512xf32>
    %cst_22 = arith.constant dense<0.000000e+00> : vector<512xf32>
    %97 = vector.multi_reduction <add>, %96, %cst_22 [0] : vector<3x512xf32> to vector<512xf32>
    %98 = vector.shape_cast %97 : vector<512xf32> to vector<1x512xf32>
    %99 = vector.extract_strided_slice %93 {offsets = [3, 0], sizes = [3, 512], strides = [1, 1]} : vector<6x512xf32> to vector<3x512xf32>
    %100 = math.absf %99 : vector<3x512xf32>
    %cst_23 = arith.constant dense<0.000000e+00> : vector<512xf32>
    %101 = vector.multi_reduction <add>, %100, %cst_23 [0] : vector<3x512xf32> to vector<512xf32>
    %102 = vector.shape_cast %101 : vector<512xf32> to vector<1x512xf32>
    %cst_24 = arith.constant -5.000000e-03 : f32
    %103 = vector.broadcast %cst_24 : f32 to vector<1x512xf32>
    %104 = arith.mulf %98, %103 : vector<1x512xf32>
    %105 = math.exp %104 : vector<1x512xf32>
    %c5 = arith.constant 5 : index
    %c0_25 = arith.constant 0 : index
    %106 = vector.load %arg0[%c5, %c0_25] : memref<12x512xf32, #tpu.memory_space<vmem>>, vector<1x512xf32>
    %107 = arith.mulf %106, %105 : vector<1x512xf32>
    %108 = arith.mulf %107, %102 : vector<1x512xf32>
    %109 = arith.addf %91, %108 : vector<1x512xf32>
    %c33_i32 = arith.constant 33 : i32
    %110 = tpu.dynamic_rotate %0 by %c33_i32 dim 1 : vector<6x512xf32>, i32 -> vector<6x512xf32>
    %111 = arith.subf %110, %0 : vector<6x512xf32>
    %112 = vector.extract_strided_slice %111 {offsets = [0, 0], sizes = [3, 512], strides = [1, 1]} : vector<6x512xf32> to vector<3x512xf32>
    %113 = vector.extract_strided_slice %111 {offsets = [0, 0], sizes = [3, 512], strides = [1, 1]} : vector<6x512xf32> to vector<3x512xf32>
    %114 = arith.mulf %112, %113 : vector<3x512xf32>
    %cst_26 = arith.constant dense<0.000000e+00> : vector<512xf32>
    %115 = vector.multi_reduction <add>, %114, %cst_26 [0] : vector<3x512xf32> to vector<512xf32>
    %116 = vector.shape_cast %115 : vector<512xf32> to vector<1x512xf32>
    %117 = vector.extract_strided_slice %111 {offsets = [3, 0], sizes = [3, 512], strides = [1, 1]} : vector<6x512xf32> to vector<3x512xf32>
    %118 = math.absf %117 : vector<3x512xf32>
    %cst_27 = arith.constant dense<0.000000e+00> : vector<512xf32>
    %119 = vector.multi_reduction <add>, %118, %cst_27 [0] : vector<3x512xf32> to vector<512xf32>
    %120 = vector.shape_cast %119 : vector<512xf32> to vector<1x512xf32>
    %cst_28 = arith.constant -5.000000e-03 : f32
    %121 = vector.broadcast %cst_28 : f32 to vector<1x512xf32>
    %122 = arith.mulf %116, %121 : vector<1x512xf32>
    %123 = math.exp %122 : vector<1x512xf32>
    %c6 = arith.constant 6 : index
    %c0_29 = arith.constant 0 : index
    %124 = vector.load %arg0[%c6, %c0_29] : memref<12x512xf32, #tpu.memory_space<vmem>>, vector<1x512xf32>
    %125 = arith.mulf %124, %123 : vector<1x512xf32>
    %126 = arith.mulf %125, %120 : vector<1x512xf32>
    %127 = arith.addf %109, %126 : vector<1x512xf32>
    %c31_i32 = arith.constant 31 : i32
    %128 = tpu.dynamic_rotate %0 by %c31_i32 dim 1 : vector<6x512xf32>, i32 -> vector<6x512xf32>
    %129 = arith.subf %128, %0 : vector<6x512xf32>
    %130 = vector.extract_strided_slice %129 {offsets = [0, 0], sizes = [3, 512], strides = [1, 1]} : vector<6x512xf32> to vector<3x512xf32>
    %131 = vector.extract_strided_slice %129 {offsets = [0, 0], sizes = [3, 512], strides = [1, 1]} : vector<6x512xf32> to vector<3x512xf32>
    %132 = arith.mulf %130, %131 : vector<3x512xf32>
    %cst_30 = arith.constant dense<0.000000e+00> : vector<512xf32>
    %133 = vector.multi_reduction <add>, %132, %cst_30 [0] : vector<3x512xf32> to vector<512xf32>
    %134 = vector.shape_cast %133 : vector<512xf32> to vector<1x512xf32>
    %135 = vector.extract_strided_slice %129 {offsets = [3, 0], sizes = [3, 512], strides = [1, 1]} : vector<6x512xf32> to vector<3x512xf32>
    %136 = math.absf %135 : vector<3x512xf32>
    %cst_31 = arith.constant dense<0.000000e+00> : vector<512xf32>
    %137 = vector.multi_reduction <add>, %136, %cst_31 [0] : vector<3x512xf32> to vector<512xf32>
    %138 = vector.shape_cast %137 : vector<512xf32> to vector<1x512xf32>
    %cst_32 = arith.constant -5.000000e-03 : f32
    %139 = vector.broadcast %cst_32 : f32 to vector<1x512xf32>
    %140 = arith.mulf %134, %139 : vector<1x512xf32>
    %141 = math.exp %140 : vector<1x512xf32>
    %c7 = arith.constant 7 : index
    %c0_33 = arith.constant 0 : index
    %142 = vector.load %arg0[%c7, %c0_33] : memref<12x512xf32, #tpu.memory_space<vmem>>, vector<1x512xf32>
    %143 = arith.mulf %142, %141 : vector<1x512xf32>
    %144 = arith.mulf %143, %138 : vector<1x512xf32>
    %145 = arith.addf %127, %144 : vector<1x512xf32>
    %c18_i32 = arith.constant 18 : i32
    %146 = tpu.dynamic_rotate %0 by %c18_i32 dim 1 : vector<6x512xf32>, i32 -> vector<6x512xf32>
    %147 = arith.subf %146, %0 : vector<6x512xf32>
    %148 = vector.extract_strided_slice %147 {offsets = [0, 0], sizes = [3, 512], strides = [1, 1]} : vector<6x512xf32> to vector<3x512xf32>
    %149 = vector.extract_strided_slice %147 {offsets = [0, 0], sizes = [3, 512], strides = [1, 1]} : vector<6x512xf32> to vector<3x512xf32>
    %150 = arith.mulf %148, %149 : vector<3x512xf32>
    %cst_34 = arith.constant dense<0.000000e+00> : vector<512xf32>
    %151 = vector.multi_reduction <add>, %150, %cst_34 [0] : vector<3x512xf32> to vector<512xf32>
    %152 = vector.shape_cast %151 : vector<512xf32> to vector<1x512xf32>
    %153 = vector.extract_strided_slice %147 {offsets = [3, 0], sizes = [3, 512], strides = [1, 1]} : vector<6x512xf32> to vector<3x512xf32>
    %154 = math.absf %153 : vector<3x512xf32>
    %cst_35 = arith.constant dense<0.000000e+00> : vector<512xf32>
    %155 = vector.multi_reduction <add>, %154, %cst_35 [0] : vector<3x512xf32> to vector<512xf32>
    %156 = vector.shape_cast %155 : vector<512xf32> to vector<1x512xf32>
    %cst_36 = arith.constant -5.000000e-03 : f32
    %157 = vector.broadcast %cst_36 : f32 to vector<1x512xf32>
    %158 = arith.mulf %152, %157 : vector<1x512xf32>
    %159 = math.exp %158 : vector<1x512xf32>
    %c8 = arith.constant 8 : index
    %c0_37 = arith.constant 0 : index
    %160 = vector.load %arg0[%c8, %c0_37] : memref<12x512xf32, #tpu.memory_space<vmem>>, vector<1x512xf32>
    %161 = arith.mulf %160, %159 : vector<1x512xf32>
    %162 = arith.mulf %161, %156 : vector<1x512xf32>
    %163 = arith.addf %145, %162 : vector<1x512xf32>
    %c14_i32 = arith.constant 14 : i32
    %164 = tpu.dynamic_rotate %0 by %c14_i32 dim 1 : vector<6x512xf32>, i32 -> vector<6x512xf32>
    %165 = arith.subf %164, %0 : vector<6x512xf32>
    %166 = vector.extract_strided_slice %165 {offsets = [0, 0], sizes = [3, 512], strides = [1, 1]} : vector<6x512xf32> to vector<3x512xf32>
    %167 = vector.extract_strided_slice %165 {offsets = [0, 0], sizes = [3, 512], strides = [1, 1]} : vector<6x512xf32> to vector<3x512xf32>
    %168 = arith.mulf %166, %167 : vector<3x512xf32>
    %cst_38 = arith.constant dense<0.000000e+00> : vector<512xf32>
    %169 = vector.multi_reduction <add>, %168, %cst_38 [0] : vector<3x512xf32> to vector<512xf32>
    %170 = vector.shape_cast %169 : vector<512xf32> to vector<1x512xf32>
    %171 = vector.extract_strided_slice %165 {offsets = [3, 0], sizes = [3, 512], strides = [1, 1]} : vector<6x512xf32> to vector<3x512xf32>
    %172 = math.absf %171 : vector<3x512xf32>
    %cst_39 = arith.constant dense<0.000000e+00> : vector<512xf32>
    %173 = vector.multi_reduction <add>, %172, %cst_39 [0] : vector<3x512xf32> to vector<512xf32>
    %174 = vector.shape_cast %173 : vector<512xf32> to vector<1x512xf32>
    %cst_40 = arith.constant -5.000000e-03 : f32
    %175 = vector.broadcast %cst_40 : f32 to vector<1x512xf32>
    %176 = arith.mulf %170, %175 : vector<1x512xf32>
    %177 = math.exp %176 : vector<1x512xf32>
    %c9 = arith.constant 9 : index
    %c0_41 = arith.constant 0 : index
    %178 = vector.load %arg0[%c9, %c0_41] : memref<12x512xf32, #tpu.memory_space<vmem>>, vector<1x512xf32>
    %179 = arith.mulf %178, %177 : vector<1x512xf32>
    %180 = arith.mulf %179, %174 : vector<1x512xf32>
    %181 = arith.addf %163, %180 : vector<1x512xf32>
    %c34_i32 = arith.constant 34 : i32
    %182 = tpu.dynamic_rotate %0 by %c34_i32 dim 1 : vector<6x512xf32>, i32 -> vector<6x512xf32>
    %183 = arith.subf %182, %0 : vector<6x512xf32>
    %184 = vector.extract_strided_slice %183 {offsets = [0, 0], sizes = [3, 512], strides = [1, 1]} : vector<6x512xf32> to vector<3x512xf32>
    %185 = vector.extract_strided_slice %183 {offsets = [0, 0], sizes = [3, 512], strides = [1, 1]} : vector<6x512xf32> to vector<3x512xf32>
    %186 = arith.mulf %184, %185 : vector<3x512xf32>
    %cst_42 = arith.constant dense<0.000000e+00> : vector<512xf32>
    %187 = vector.multi_reduction <add>, %186, %cst_42 [0] : vector<3x512xf32> to vector<512xf32>
    %188 = vector.shape_cast %187 : vector<512xf32> to vector<1x512xf32>
    %189 = vector.extract_strided_slice %183 {offsets = [3, 0], sizes = [3, 512], strides = [1, 1]} : vector<6x512xf32> to vector<3x512xf32>
    %190 = math.absf %189 : vector<3x512xf32>
    %cst_43 = arith.constant dense<0.000000e+00> : vector<512xf32>
    %191 = vector.multi_reduction <add>, %190, %cst_43 [0] : vector<3x512xf32> to vector<512xf32>
    %192 = vector.shape_cast %191 : vector<512xf32> to vector<1x512xf32>
    %cst_44 = arith.constant -5.000000e-03 : f32
    %193 = vector.broadcast %cst_44 : f32 to vector<1x512xf32>
    %194 = arith.mulf %188, %193 : vector<1x512xf32>
    %195 = math.exp %194 : vector<1x512xf32>
    %c10 = arith.constant 10 : index
    %c0_45 = arith.constant 0 : index
    %196 = vector.load %arg0[%c10, %c0_45] : memref<12x512xf32, #tpu.memory_space<vmem>>, vector<1x512xf32>
    %197 = arith.mulf %196, %195 : vector<1x512xf32>
    %198 = arith.mulf %197, %192 : vector<1x512xf32>
    %199 = arith.addf %181, %198 : vector<1x512xf32>
    %c30_i32 = arith.constant 30 : i32
    %200 = tpu.dynamic_rotate %0 by %c30_i32 dim 1 : vector<6x512xf32>, i32 -> vector<6x512xf32>
    %201 = arith.subf %200, %0 : vector<6x512xf32>
    %202 = vector.extract_strided_slice %201 {offsets = [0, 0], sizes = [3, 512], strides = [1, 1]} : vector<6x512xf32> to vector<3x512xf32>
    %203 = vector.extract_strided_slice %201 {offsets = [0, 0], sizes = [3, 512], strides = [1, 1]} : vector<6x512xf32> to vector<3x512xf32>
    %204 = arith.mulf %202, %203 : vector<3x512xf32>
    %cst_46 = arith.constant dense<0.000000e+00> : vector<512xf32>
    %205 = vector.multi_reduction <add>, %204, %cst_46 [0] : vector<3x512xf32> to vector<512xf32>
    %206 = vector.shape_cast %205 : vector<512xf32> to vector<1x512xf32>
    %207 = vector.extract_strided_slice %201 {offsets = [3, 0], sizes = [3, 512], strides = [1, 1]} : vector<6x512xf32> to vector<3x512xf32>
    %208 = math.absf %207 : vector<3x512xf32>
    %cst_47 = arith.constant dense<0.000000e+00> : vector<512xf32>
    %209 = vector.multi_reduction <add>, %208, %cst_47 [0] : vector<3x512xf32> to vector<512xf32>
    %210 = vector.shape_cast %209 : vector<512xf32> to vector<1x512xf32>
    %cst_48 = arith.constant -5.000000e-03 : f32
    %211 = vector.broadcast %cst_48 : f32 to vector<1x512xf32>
    %212 = arith.mulf %206, %211 : vector<1x512xf32>
    %213 = math.exp %212 : vector<1x512xf32>
    %c11 = arith.constant 11 : index
    %c0_49 = arith.constant 0 : index
    %214 = vector.load %arg0[%c11, %c0_49] : memref<12x512xf32, #tpu.memory_space<vmem>>, vector<1x512xf32>
    %215 = arith.mulf %214, %213 : vector<1x512xf32>
    %216 = arith.mulf %215, %210 : vector<1x512xf32>
    %217 = arith.addf %199, %216 : vector<1x512xf32>
    %218 = vector.shape_cast %217 : vector<1x512xf32> to vector<1x1x512xf32>
    %cst_50 = arith.constant dense<0.000000e+00> : vector<1xf32>
    %219 = vector.multi_reduction <add>, %218, %cst_50 [1, 2] : vector<1x1x512xf32> to vector<1xf32>
    %220 = vector.shape_cast %219 : vector<1xf32> to vector<1x1x1xf32>
    %221 = vector.extract %220[0, 0, 0] : f32 from vector<1x1x1xf32>
    %222 = vector.broadcast %221 : f32 to vector<1x128xf32>
    %c0_51 = arith.constant 0 : index
    %c0_52 = arith.constant 0 : index
    %223 = vector.load %arg2[%c0_51, %c0_52] : memref<1x128xf32, #tpu.memory_space<vmem>>, vector<1x128xf32>
    tpu.vector_store %arg2[%c0_51, %c0_52], %222 {strides = array<i32>} : memref<1x128xf32, #tpu.memory_space<vmem>>, vector<1x128xf32>,
    return
  }
}

</mosaic_0001>

<bundles_post_ra>
// kernel: smooth_loss.1
= control target key start
LH: loop header
LB: loop body
LE: loop exit
PB: predicated region body
PF: predicated region fallthrough
CT: control target
= control target key end

     0   :  { %s2241_s13 = smov 16   ;;  %s3054_s0 = inlined_call_operand.vmem [shape: f32[12,512], index: 0, kind: input, shape index: {}]   ;;  %s3055_s1 = inlined_call_operand.vmem [shape: f32[6,512], index: 1, kind: input, shape index: {}]   ;;  %s3056_s2 = inlined_call_operand.hbm [shape: f32[1,128], index: 2, kind: output, shape index: {}]  }
   0x1   :  { %v2273_v0 = vld [vmem:[%s3055_s1 + $0x10] sm:$0x3f]  ;;  %v2278_v1 = vld [vmem:[%s3055_s1] sm:$0x3f]  ;;  %v2285_v2 = vld [vmem:[%s3055_s1 + $0x18] sm:$0x3f] }
   0x2   :  { %20 = vrot.lane.b32.xlu1 %v2273_v0, %s2241_s13  ;;  %16 = vrot.lane.b32.xlu0 %v2278_v1, %s2241_s13  ;;  %v2290_v3 = vld [vmem:[%s3055_s1 + $0x8] sm:$0x3f] }
   0x3   :  { %7 = vsyncpa [#allocation3], 0  ;;  %s2242_s18 = smov 1   ;;  %s2243_s19 = smov 17   ;;  %v24_v4 = vlaneseq  ;;  %v2253_v6 = vmov 1966171168  }
   0x4   :  { %s2244_s20 = smov 15   ;;  %s2245_s21 = smov 32   ;;  %v132_v7 = vunpack.c.l.s4 %v2253_v6  ;;  %vm39_vm1 = vcmask 1042432   ;;  %vm2055_vm13 = vcmask 1040384  }
   0x5   :  { %s2246_s22 = smov 2   ;;  %s2247_s23 = smov 33   ;;  %v2338_v5 = vand.u32 127, %v24_v4  ;;  %v2341_v11 = vshrl.u32 %v24_v4, 7 }
   0x6   :  { %22 = vrot.lane.b32.xlu1 %v2285_v2, %s2241_s13  ;;  %18 = vrot.lane.b32.xlu0 %v2290_v3, %s2241_s13  ;;  %s2248_s24 = smov 31   ;;  %s2249_s25 = smov 18   ;;  %v133_v10 = vunpack.c.0.s8 %v132_v7 }
   0x7   :  { %s2250_s26 = smov 14   ;;  %s2251_s27 = smov 34   ;;  %vm26_vm0 = vcmp.lt.s32.totalorder %v2338_v5, 16  ;;  %vm194_vm2 = vcmp.lt.s32.totalorder %v2338_v5, 1  ;;  %vm362_vm3 = vcmp.lt.s32.totalorder %v2338_v5, 17  ;;  %vm530_vm4 = vcmp.lt.s32.totalorder %v2338_v5, 15 }
   0x8   :  { %s2252_s28 = smov 30   ;;  %v2348_v22 = vsub.s32 %v133_v10, %v2341_v11  ;;  %vm698_vm5 = vcmp.lt.s32.totalorder %v2338_v5, 32  ;;  %vm866_vm6 = vcmp.lt.s32.totalorder %v2338_v5, 2  ;;  %vm1034_vm7 = vcmp.lt.s32.totalorder %v2338_v5, 33 }
   0x9   :  { %vm1202_vm8 = vcmp.lt.s32.totalorder %v2338_v5, 31  ;;  %vm1370_vm9 = vcmp.lt.s32.totalorder %v2338_v5, 18  ;;  %vm1538_vm10 = vcmp.lt.s32.totalorder %v2338_v5, 14  ;;  %vm1706_vm11 = vcmp.lt.s32.totalorder %v2338_v5, 34 }
   0xa   :  { %188 = vrot.lane.b32.xlu1 %v2290_v3, %s2242_s18  ;;  %186 = vrot.lane.b32.xlu0 %v2278_v1, %s2242_s18  ;;  %vm1874_vm12 = vcmp.lt.s32.totalorder %v2338_v5, 30 }
   0xe   :  { %192 = vrot.lane.b32.xlu1 %v2285_v2, %s2242_s18  ;;  %190 = vrot.lane.b32.xlu0 %v2273_v0, %s2242_s18 }
  0x12   :  { %356 = vrot.lane.b32.xlu1 %v2290_v3, %s2243_s19  ;;  %354 = vrot.lane.b32.xlu0 %v2278_v1, %s2243_s19 }
  0x16   :  { %360 = vrot.lane.b32.xlu1 %v2285_v2, %s2243_s19  ;;  %358 = vrot.lane.b32.xlu0 %v2273_v0, %s2243_s19 }
  0x1a   :  { %524 = vrot.lane.b32.xlu1 %v2290_v3, %s2244_s20  ;;  %522 = vrot.lane.b32.xlu0 %v2278_v1, %s2244_s20 }
  0x1e   :  { %528 = vrot.lane.b32.xlu1 %v2285_v2, %s2244_s20  ;;  %526 = vrot.lane.b32.xlu0 %v2273_v0, %s2244_s20 }
  0x22   :  { %692 = vrot.lane.b32.xlu1 %v2290_v3, %s2245_s21  ;;  %690 = vrot.lane.b32.xlu0 %v2278_v1, %s2245_s21 }
  0x26   :  { %696 = vrot.lane.b32.xlu1 %v2285_v2, %s2245_s21  ;;  %694 = vrot.lane.b32.xlu0 %v2273_v0, %s2245_s21 }
  0x2a   :  { %860 = vrot.lane.b32.xlu1 %v2290_v3, %s2246_s22  ;;  %858 = vrot.lane.b32.xlu0 %v2278_v1, %s2246_s22 }
  0x2e   :  { %864 = vrot.lane.b32.xlu1 %v2285_v2, %s2246_s22  ;;  %862 = vrot.lane.b32.xlu0 %v2273_v0, %s2246_s22 }
  0x32   :  { %1028 = vrot.lane.b32.xlu1 %v2290_v3, %s2247_s23  ;;  %1026 = vrot.lane.b32.xlu0 %v2278_v1, %s2247_s23 }
  0x36   :  { %1032 = vrot.lane.b32.xlu1 %v2285_v2, %s2247_s23  ;;  %1030 = vrot.lane.b32.xlu0 %v2273_v0, %s2247_s23 }
  0x3a   :  { %1196 = vrot.lane.b32.xlu1 %v2290_v3, %s2248_s24  ;;  %1194 = vrot.lane.b32.xlu0 %v2278_v1, %s2248_s24 }
  0x3e   :  { %1200 = vrot.lane.b32.xlu1 %v2285_v2, %s2248_s24  ;;  %1198 = vrot.lane.b32.xlu0 %v2273_v0, %s2248_s24 }
  0x42   :  { %1364 = vrot.lane.b32.xlu1 %v2290_v3, %s2249_s25  ;;  %1362 = vrot.lane.b32.xlu0 %v2278_v1, %s2249_s25 }
  0x46   :  { %1368 = vrot.lane.b32.xlu1 %v2285_v2, %s2249_s25  ;;  %1366 = vrot.lane.b32.xlu0 %v2273_v0, %s2249_s25 }
  0x4a   :  { %1532 = vrot.lane.b32.xlu1 %v2290_v3, %s2250_s26  ;;  %1530 = vrot.lane.b32.xlu0 %v2278_v1, %s2250_s26 }
  0x4e   :  { %1536 = vrot.lane.b32.xlu1 %v2285_v2, %s2250_s26  ;;  %1534 = vrot.lane.b32.xlu0 %v2273_v0, %s2250_s26 }
  0x52   :  { %1700 = vrot.lane.b32.xlu1 %v2290_v3, %s2251_s27  ;;  %1698 = vrot.lane.b32.xlu0 %v2278_v1, %s2251_s27 }
  0x56   :  { %1704 = vrot.lane.b32.xlu1 %v2285_v2, %s2251_s27  ;;  %1702 = vrot.lane.b32.xlu0 %v2273_v0, %s2251_s27 }
  0x5a   :  { %1868 = vrot.lane.b32.xlu1 %v2290_v3, %s2252_s28  ;;  %1866 = vrot.lane.b32.xlu0 %v2278_v1, %s2252_s28 }
  0x5e   :  { %1872 = vrot.lane.b32.xlu1 %v2285_v2, %s2252_s28  ;;  %1870 = vrot.lane.b32.xlu0 %v2273_v0, %s2252_s28 }
  0x74   :  { %v21_v8 = vpop.permute.xlu1 %20  ;;  %v17_v9 = vpop.permute.xlu0 %16 }
  0x78   :  { %v23_v12 = vpop.permute.xlu1 %22  ;;  %v19_v13 = vpop.permute.xlu0 %18 }
  0x79   :  { %v27_v14 = vsel %vm26_vm0, %v21_v8, %v23_v12  ;;  %v30_v15 = vsel %vm26_vm0, %v23_v12, %v17_v9  ;;  %v28_v16 = vsel %vm26_vm0, %v19_v13, %v21_v8  ;;  %v29_v17 = vsel %vm26_vm0, %v17_v9, %v19_v13 }
  0x7a   :  { %v31_v18 = vsub.f32 %v30_v15, %v2278_v1  ;;  %v34_v19 = vsub.f32 %v27_v14, %v2285_v2  ;;  %v32_v20 = vsub.f32 %v29_v17, %v2290_v3  ;;  %v33_v21 = vsub.f32 %v28_v16, %v2273_v0 }
  0x7c   :  { %v35_v23 = vmul.f32 %v31_v18, %v31_v18  ;;  %v38_v24 = vmul.f32 %v34_v19, %v34_v19  ;;  %v68_v25 = vand.u32 2147483647, %v31_v18  ;;  %v71_v26 = vand.u32 2147483647, %v34_v19  ;;  %v189_v59 = vpop.permute.xlu1 %188  ;;  %v187_v9 = vpop.permute.xlu0 %186 }
  0x7d   :  { %v36_v27 = vmul.f32 %v32_v20, %v32_v20  ;;  %v37_v28 = vmul.f32 %v33_v21, %v33_v21  ;;  %v69_v29 = vand.u32 2147483647, %v32_v20  ;;  %v70_v30 = vand.u32 2147483647, %v33_v21 }
  0x7e   :  { %v40_v31 = vsel %vm39_vm1, %v35_v23, 0.0  ;;  %v61_v32 = vsel %vm39_vm1, %v38_v24, 0.0  ;;  %v76_v33 = vrot.slane %v68_v25, 3  ;;  %v79_v34 = vrot.slane %v71_v26, 3 }
  0x7f   :  { %v41_v35 = vrot.slane %v40_v31, 4  ;;  %v62_v36 = vrot.slane %v61_v32, 4  ;;  %v47_v37 = vsel %vm39_vm1, %v36_v27, 0.0  ;;  %v54_v38 = vsel %vm39_vm1, %v37_v28, 0.0 }
  0x80   :  { %v84_v39 = vsel %vm39_vm1, %v76_v33, 0.0  ;;  %v105_v40 = vsel %vm39_vm1, %v79_v34, 0.0  ;;  %v48_v41 = vrot.slane %v47_v37, 4  ;;  %v55_v42 = vrot.slane %v54_v38, 4  ;;  %v193_v28 = vpop.permute.xlu1 %192 }
  0x81   :  { %v42_v43 = vadd.f32 %v41_v35, %v40_v31  ;;  %v63_v44 = vadd.f32 %v62_v36, %v61_v32  ;;  %v85_v45 = vrot.slane %v84_v39, 4  ;;  %v106_v46 = vrot.slane %v105_v40, 4 }
  0x82   :  { %v49_v47 = vadd.f32 %v48_v41, %v47_v37  ;;  %v56_v48 = vadd.f32 %v55_v42, %v54_v38  ;;  %v77_v49 = vrot.slane %v69_v29, 3  ;;  %v78_v50 = vrot.slane %v70_v30, 3  ;;  %v191_v37 = vpop.permute.xlu0 %190 }
  0x83   :  { %v43_v51 = vrot.slane %v42_v43, 2  ;;  %v64_v52 = vrot.slane %v63_v44, 2  ;;  %v86_v53 = vadd.f32 %v85_v45, %v84_v39  ;;  %v107_v54 = vadd.f32 %v106_v46, %v105_v40 }
  0x84   :  { %v50_v55 = vrot.slane %v49_v47, 2  ;;  %v57_v56 = vrot.slane %v56_v48, 2  ;;  %v91_v57 = vsel %vm39_vm1, %v77_v49, 0.0  ;;  %v98_v58 = vsel %vm39_vm1, %v78_v50, 0.0 }
  0x85   :  { %v44_v60 = vadd.f32 %v43_v51, %v42_v43  ;;  %v65_v61 = vadd.f32 %v64_v52, %v63_v44  ;;  %v87_v62 = vrot.slane %v86_v53, 2  ;;  %v108_v63 = vrot.slane %v107_v54, 2 }
  0x86   :  { %v51_v4 = vadd.f32 %v50_v55, %v49_v47  ;;  %v58_v6 = vadd.f32 %v57_v56, %v56_v48  ;;  %v92_v7 = vrot.slane %v91_v57, 4  ;;  %v99_v8 = vrot.slane %v98_v58, 4 }
  0x87   :  { %v45_v10 = vrot.slane %v44_v60, 1  ;;  %v66_v12 = vrot.slane %v65_v61, 1  ;;  %v88_v13 = vadd.f32 %v87_v62, %v86_v53  ;;  %v109_v14 = vadd.f32 %v108_v63, %v107_v54 }
  0x88   :  { %v52_v15 = vrot.slane %v51_v4, 1  ;;  %v59_v16 = vrot.slane %v58_v6, 1  ;;  %v93_v17 = vadd.f32 %v92_v7, %v91_v57  ;;  %v100_v18 = vadd.f32 %v99_v8, %v98_v58 }
  0x89   :  { %v46_v19 = vadd.f32 %v45_v10, %v44_v60  ;;  %v67_v20 = vadd.f32 %v66_v12, %v65_v61  ;;  %v89_v21 = vrot.slane %v88_v13, 1  ;;  %v110_v23 = vrot.slane %v109_v14, 1 }
  0x8a   :  { %v53_v24 = vadd.f32 %v52_v15, %v51_v4  ;;  %v60_v25 = vadd.f32 %v59_v16, %v58_v6  ;;  %v94_v26 = vrot.slane %v93_v17, 2  ;;  %v101_v27 = vrot.slane %v100_v18, 2 }
  0x8b   :  { %v90_v29 = vadd.f32 %v89_v21, %v88_v13  ;;  %v111_v30 = vadd.f32 %v110_v23, %v109_v14  ;;  %v112_v31 = vmul.f32 -0.005, %v46_v19  ;;  %v115_v32 = vmul.f32 -0.005, %v67_v20 }
  0x8c   :  { %v95_v33 = vadd.f32 %v94_v26, %v93_v17  ;;  %v102_v34 = vadd.f32 %v101_v27, %v100_v18  ;;  %v113_v35 = vmul.f32 -0.005, %v53_v24  ;;  %v114_v36 = vmul.f32 -0.005, %v60_v25 }
  0x8d   :  { %v116_v38 = vmul.f32 1.442695, %v112_v31  ;;  %v122_v39 = vmul.f32 1.442695, %v115_v32  ;;  %v197_v40 = vsel %vm194_vm2, %v187_v9, %v189_v59  ;;  %v198_v41 = vsel %vm194_vm2, %v193_v28, %v187_v9 }
  0x8e   :  { %v96_v42 = vrot.slane %v95_v33, 1  ;;  %v103_v43 = vrot.slane %v102_v34, 1  ;;  %v118_v44 = vmul.f32 1.442695, %v113_v35  ;;  %v120_v45 = vmul.f32 1.442695, %v114_v36 }
  0x8f   :  { %2115 = vpow2.f32 %v116_v38  ;;  %v200_v46 = vsub.f32 %v197_v40, %v2290_v3  ;;  %v199_v47 = vsub.f32 %v198_v41, %v2278_v1  ;;  %v195_v48 = vsel %vm194_vm2, %v191_v37, %v193_v28 }
  0x90   :  { %2117 = vpow2.f32 %v122_v39  ;;  %v97_v49 = vadd.f32 %v96_v42, %v95_v33  ;;  %v104_v50 = vadd.f32 %v103_v43, %v102_v34  ;;  %v196_v51 = vsel %vm194_vm2, %v189_v59, %v191_v37 }
  0x91   :  { %2119 = vpow2.f32 %v118_v44  ;;  %v204_v52 = vmul.f32 %v200_v46, %v200_v46  ;;  %v236_v53 = vand.u32 2147483647, %v200_v46  ;;  %v203_v54 = vmul.f32 %v199_v47, %v199_v47 }
  0x92   :  { %2121 = vpow2.f32 %v120_v45  ;;  %v159_v55 = vcombine.low %v90_v29, %v97_v49  ;;  %v160_v56 = vcombine.low %v104_v50, %v111_v30  ;;  %v235_v57 = vand.u32 2147483647, %v199_v47 }
  0x93   :  { %v214_v58 = vsel %vm39_vm1, %v204_v52, 0.0  ;;  %v244_v60 = vrot.slane %v236_v53, 3  ;;  %v207_v61 = vsel %vm39_vm1, %v203_v54, 0.0  ;;  %v201_v62 = vsub.f32 %v196_v51, %v2273_v0  ;;  %v357_v51 = vpop.permute.xlu1 %356 }
  0x94   :  { %v2373_v63 = vrot.slane %v159_v55, %v2348_v22  ;;  %v2376_v59 = vrot.slane %v160_v56, %v2348_v22  ;;  %v215_v4 = vrot.slane %v214_v58, 4  ;;  %v208_v6 = vrot.slane %v207_v61, 4 }
  0x95   :  { %v258_v7 = vsel %vm39_vm1, %v244_v60, 0.0  ;;  %v243_v8 = vrot.slane %v235_v57, 3  ;;  %v202_v9 = vsub.f32 %v195_v48, %v2285_v2  ;;  %v205_v10 = vmul.f32 %v201_v62, %v201_v62 }
  0x96   :  { %v175_v12 = vcombine.low %v2373_v63, %v2376_v59  ;;  %v216_v13 = vadd.f32 %v215_v4, %v214_v58  ;;  %v259_v14 = vrot.slane %v258_v7, 4  ;;  %v209_v15 = vadd.f32 %v208_v6, %v207_v61 }
  0x97   :  { %v251_v16 = vsel %vm39_vm1, %v243_v8, 0.0  ;;  %v206_v17 = vmul.f32 %v202_v9, %v202_v9  ;;  %v221_v18 = vsel %vm39_vm1, %v205_v10, 0.0  ;;  %v237_v19 = vand.u32 2147483647, %v201_v62  ;;  %v355_v8 = vpop.permute.xlu0 %354 }
  0x98   :  { %v217_v20 = vrot.slane %v216_v13, 2  ;;  %v260_v21 = vadd.f32 %v259_v14, %v258_v7  ;;  %v210_v23 = vrot.slane %v209_v15, 2  ;;  %v252_v24 = vrot.slane %v251_v16, 4 }
  0x99   :  { %v222_v25 = vrot.slane %v221_v18, 4  ;;  %v228_v26 = vsel %vm39_vm1, %v206_v17, 0.0  ;;  %v238_v27 = vand.u32 2147483647, %v202_v9  ;;  %v245_v34 = vrot.slane %v237_v19, 3 }
  0x9a   :  { %v218_v28 = vadd.f32 %v217_v20, %v216_v13  ;;  %v261_v29 = vrot.slane %v260_v21, 2  ;;  %v211_v30 = vadd.f32 %v210_v23, %v209_v15  ;;  %v229_v31 = vrot.slane %v228_v26, 4  ;;  %v361_v23 = vpop.permute.xlu1 %360 }
  0x9b   :  { %v253_v32 = vadd.f32 %v252_v24, %v251_v16  ;;  %v223_v33 = vadd.f32 %v222_v25, %v221_v18  ;;  %v246_v35 = vrot.slane %v238_v27, 3  ;;  %v265_v44 = vsel %vm39_vm1, %v245_v34, 0.0  ;;  %v124_v24 = vld [vmem:[%s3054_s0] ss:$8 sm:$0xf] }
  0x9c   :  { %v2116_v36 = vpop.eup %2115  ;;  %v219_v37 = vrot.slane %v218_v28, 1  ;;  %v262_v38 = vadd.f32 %v261_v29, %v260_v21  ;;  %v212_v39 = vrot.slane %v211_v30, 1  ;;  %v230_v40 = vadd.f32 %v229_v31, %v228_v26 }
  0x9d   :  { %v2118_v41 = vpop.eup %2117  ;;  %v254_v42 = vrot.slane %v253_v32, 2  ;;  %v224_v43 = vrot.slane %v223_v33, 2  ;;  %v272_v45 = vsel %vm39_vm1, %v246_v35, 0.0  ;;  %v266_v56 = vrot.slane %v265_v44, 4 }
  0x9e   :  { %v2120_v46 = vpop.eup %2119  ;;  %v220_v47 = vadd.f32 %v219_v37, %v218_v28  ;;  %v263_v48 = vrot.slane %v262_v38, 1  ;;  %v213_v49 = vadd.f32 %v212_v39, %v211_v30  ;;  %v231_v50 = vrot.slane %v230_v40, 2 }
  0x9f   :  { %v2122_v52 = vpop.eup %2121  ;;  %v129_v53 = vcombine.low %v2116_v36, %v2120_v46  ;;  %v255_v54 = vadd.f32 %v254_v42, %v253_v32  ;;  %v225_v55 = vadd.f32 %v224_v43, %v223_v33  ;;  %v267_v14 = vadd.f32 %v266_v56, %v265_v44  ;;  %v359_v43 = vpop.permute.xlu0 %358 }
  0xa0   :  { %v130_v57 = vcombine.low %v2122_v52, %v2118_v41  ;;  %v264_v58 = vadd.f32 %v263_v48, %v262_v38  ;;  %v280_v60 = vmul.f32 -0.005, %v220_v47  ;;  %v279_v61 = vmul.f32 -0.005, %v213_v49 }
  0xa1   :  { %v137_v62 = vrot.slane %v129_v53, %v2348_v22  ;;  %v256_v4 = vrot.slane %v255_v54, 1  ;;  %v226_v6 = vrot.slane %v225_v55, 1  ;;  %v232_v7 = vadd.f32 %v231_v50, %v230_v40 }
  0xa2   :  { %v144_v9 = vrot.slane %v130_v57, %v2348_v22  ;;  %v285_v10 = vmul.f32 1.442695, %v280_v60  ;;  %v283_v13 = vmul.f32 1.442695, %v279_v61  ;;  %v273_v18 = vrot.slane %v272_v45, 4 }
  0xa3   :  { %v257_v15 = vadd.f32 %v256_v4, %v255_v54  ;;  %v227_v16 = vadd.f32 %v226_v6, %v225_v55  ;;  %v233_v17 = vrot.slane %v232_v7, 1  ;;  %v268_v20 = vrot.slane %v267_v14, 2 }
  0xa4   :  { %v145_v19 = vcombine.low %v137_v62, %v144_v9  ;;  %2123 = vpow2.f32 %v285_v10  ;;  %v365_v21 = vsel %vm362_vm3, %v355_v8, %v357_v51  ;;  %v274_v27 = vadd.f32 %v273_v18, %v272_v45 }
  0xa5   :  { %2125 = vpow2.f32 %v283_v13  ;;  %v327_v25 = vcombine.low %v257_v15, %v264_v58  ;;  %v234_v26 = vadd.f32 %v233_v17, %v232_v7  ;;  %v269_v29 = vadd.f32 %v268_v20, %v267_v14 }
  0xa6   :  { %v152_v28 = vrot.slane %v145_v19, %v2348_v22  ;;  %v281_v30 = vmul.f32 -0.005, %v227_v16  ;;  %v368_v31 = vsub.f32 %v365_v21, %v2290_v3  ;;  %v182_v32 = vrot.slane %v175_v12, %v2348_v22 }
  0xa7   :  { %v275_v33 = vrot.slane %v274_v27, 2  ;;  %v282_v34 = vmul.f32 -0.005, %v234_v26  ;;  %v366_v35 = vsel %vm362_vm3, %v361_v23, %v355_v8  ;;  %v270_v37 = vrot.slane %v269_v29, 1 }
  0xa8   :  { %v154_v36 = vmul.f32 %v152_v28, %v124_v24  ;;  %v287_v38 = vmul.f32 1.442695, %v281_v30  ;;  %v372_v39 = vmul.f32 %v368_v31, %v368_v31  ;;  %v367_v42 = vsub.f32 %v366_v35, %v2278_v1  ;;  %v525_v28 = vpop.permute.xlu1 %524  ;;  %v523_v30 = vpop.permute.xlu0 %522 }
  0xa9   :  { %v276_v40 = vadd.f32 %v275_v33, %v274_v27  ;;  %v289_v41 = vmul.f32 1.442695, %v282_v34  ;;  %v271_v59 = vadd.f32 %v270_v37, %v269_v29  ;;  %v363_v47 = vsel %vm362_vm3, %v359_v43, %v361_v23 }
  0xaa   :  { %v2404_v44 = vmul.f32 %v182_v32, %v154_v36  ;;  %2127 = vpow2.f32 %v287_v38  ;;  %v382_v63 = vsel %vm39_vm1, %v372_v39, 0.0  ;;  %v371_v46 = vmul.f32 %v367_v42, %v367_v42 }
  0xab   :  { %v277_v12 = vrot.slane %v276_v40, 1  ;;  %2129 = vpow2.f32 %v289_v41  ;;  %v383_v45 = vrot.slane %v382_v63, 4  ;;  %v364_v48 = vsel %vm362_vm3, %v357_v51, %v359_v43 }
  0xac   :  { %v369_v50 = vsub.f32 %v364_v48, %v2273_v0  ;;  %v375_v52 = vsel %vm39_vm1, %v371_v46, 0.0  ;;  %v370_v53 = vsub.f32 %v363_v47, %v2285_v2  ;;  %v335_v54 = vrot.slane %v327_v25, %v2348_v22 }
  0xad   :  { %v278_v49 = vadd.f32 %v277_v12, %v276_v40  ;;  %v376_v56 = vrot.slane %v375_v52, 4  ;;  %v384_v58 = vadd.f32 %v383_v45, %v382_v63  ;;  %v404_v16 = vand.u32 2147483647, %v368_v31  ;;  %v2088_v40 = vld [vmem:[%s3054_s0 + $0x1] ss:$8 sm:$0xf]  ;;  %v529_v45 = vpop.permute.xlu1 %528 }
  0xae   :  { %v373_v57 = vmul.f32 %v369_v50, %v369_v50  ;;  %v374_v60 = vmul.f32 %v370_v53, %v370_v53  ;;  %v403_v19 = vand.u32 2147483647, %v367_v42  ;;  %v405_v38 = vand.u32 2147483647, %v369_v50 }
  0xaf   :  { %v328_v55 = vcombine.low %v271_v59, %v278_v49  ;;  %v377_v4 = vadd.f32 %v376_v56, %v375_v52  ;;  %v385_v10 = vrot.slane %v384_v58, 2  ;;  %v412_v29 = vrot.slane %v404_v16, 3 }
  0xb0   :  { %v389_v51 = vsel %vm39_vm1, %v373_v57, 0.0  ;;  %v396_v7 = vsel %vm39_vm1, %v374_v60, 0.0  ;;  %v411_v33 = vrot.slane %v403_v19, 3  ;;  %v533_v39 = vsel %vm530_vm4, %v523_v30, %v525_v28 }
  0xb1   :  { %v2124_v61 = vpop.eup %2123  ;;  %v342_v62 = vrot.slane %v328_v55, %v2348_v22  ;;  %v378_v13 = vrot.slane %v377_v4, 2  ;;  %v390_v14 = vrot.slane %v389_v51, 4  ;;  %v397_v15 = vrot.slane %v396_v7, 4 }
  0xb2   :  { %v2126_v6 = vpop.eup %2125  ;;  %v386_v23 = vadd.f32 %v385_v10, %v384_v58  ;;  %v426_v41 = vsel %vm39_vm1, %v412_v29, 0.0  ;;  %v406_v42 = vand.u32 2147483647, %v370_v53  ;;  %v419_v63 = vsel %vm39_vm1, %v411_v33, 0.0 }
  0xb3   :  { %v297_v8 = vcombine.low %v2126_v6, %v2124_v61  ;;  %v343_v9 = vcombine.low %v335_v54, %v342_v62  ;;  %v391_v17 = vadd.f32 %v390_v14, %v389_v51  ;;  %v398_v20 = vadd.f32 %v397_v15, %v396_v7  ;;  %v527_v6 = vpop.permute.xlu0 %526 }
  0xb4   :  { %v379_v24 = vadd.f32 %v378_v13, %v377_v4  ;;  %v387_v34 = vrot.slane %v386_v23, 1  ;;  %v536_v12 = vsub.f32 %v533_v39, %v2290_v3  ;;  %v413_v52 = vrot.slane %v405_v38, 3 }
  0xb5   :  { %v305_v25 = vrot.slane %v297_v8, %v2348_v22  ;;  %v392_v27 = vrot.slane %v391_v17, 2  ;;  %v399_v31 = vrot.slane %v398_v20, 2  ;;  %v350_v49 = vrot.slane %v343_v9, %v2348_v22 }
  0xb6   :  { %v380_v35 = vrot.slane %v379_v24, 1  ;;  %v388_v46 = vadd.f32 %v387_v34, %v386_v23  ;;  %v427_v54 = vrot.slane %v426_v41, 4  ;;  %v420_v55 = vrot.slane %v419_v63, 4 }
  0xb7   :  { %v2128_v18 = vpop.eup %2127  ;;  %v393_v37 = vadd.f32 %v392_v27, %v391_v17  ;;  %v400_v59 = vadd.f32 %v399_v31, %v398_v20  ;;  %v414_v56 = vrot.slane %v406_v42, 3  ;;  %v534_v53 = vsel %vm530_vm4, %v529_v45, %v523_v30 }
  0xb8   :  { %v2130_v21 = vpop.eup %2129  ;;  %v381_v47 = vadd.f32 %v380_v35, %v379_v24  ;;  %v540_v60 = vmul.f32 %v536_v12, %v536_v12  ;;  %v448_v61 = vmul.f32 -0.005, %v388_v46  ;;  %v535_v4 = vsub.f32 %v534_v53, %v2278_v1  ;;  %v2448_v35 = vpop.permute.xlu1 %692 }
  0xb9   :  { %v298_v26 = vcombine.low %v2128_v18, %v2130_v21  ;;  %v394_v50 = vrot.slane %v393_v37, 1  ;;  %v401_v58 = vrot.slane %v400_v59, 1  ;;  %v433_v8 = vsel %vm39_vm1, %v413_v52, 0.0 }
  0xba   :  { %v447_v62 = vmul.f32 -0.005, %v381_v47  ;;  %v428_v9 = vadd.f32 %v427_v54, %v426_v41  ;;  %v421_v10 = vadd.f32 %v420_v55, %v419_v63  ;;  %v440_v13 = vsel %vm39_vm1, %v414_v56, 0.0 }
  0xbb   :  { %v312_v32 = vrot.slane %v298_v26, %v2348_v22  ;;  %v395_v7 = vadd.f32 %v394_v50, %v393_v37  ;;  %v539_v14 = vmul.f32 %v535_v4, %v535_v4  ;;  %v402_v15 = vadd.f32 %v401_v58, %v400_v59 }
  0xbc   :  { %v550_v16 = vsel %vm39_vm1, %v540_v60, 0.0  ;;  %v531_v17 = vsel %vm530_vm4, %v527_v6, %v529_v45  ;;  %v532_v18 = vsel %vm530_vm4, %v525_v28, %v527_v6  ;;  %v453_v19 = vmul.f32 1.442695, %v448_v61 }
  0xbd   :  { %v313_v36 = vcombine.low %v305_v25, %v312_v32  ;;  %v434_v20 = vrot.slane %v433_v8, 4  ;;  %v543_v21 = vsel %vm39_vm1, %v539_v14, 0.0  ;;  %v449_v23 = vmul.f32 -0.005, %v395_v7 }
  0xbe   :  { %v544_v24 = vrot.slane %v543_v21, 4  ;;  %v537_v25 = vsub.f32 %v532_v18, %v2273_v0  ;;  %v538_v26 = vsub.f32 %v531_v17, %v2285_v2  ;;  %v441_v27 = vrot.slane %v440_v13, 4 }
  0xbf   :  { %v320_v43 = vrot.slane %v313_v36, %v2348_v22  ;;  %v551_v29 = vrot.slane %v550_v16, 4  ;;  %v450_v30 = vmul.f32 -0.005, %v402_v15  ;;  %v572_v32 = vand.u32 2147483647, %v536_v12  ;;  %v691_v36 = vpop.permute.xlu0 %690 }
  0xc0   :  { %v541_v33 = vmul.f32 %v537_v25, %v537_v25  ;;  %v429_v31 = vrot.slane %v428_v9, 2  ;;  %2131 = vpow2.f32 %v453_v19  ;;  %v545_v28 = vadd.f32 %v544_v24, %v543_v21 }
  0xc1   :  { %v322_v48 = vmul.f32 %v2088_v40, %v320_v43  ;;  %v542_v34 = vmul.f32 %v538_v26, %v538_v26  ;;  %v422_v37 = vrot.slane %v421_v10, 2  ;;  %v435_v38 = vadd.f32 %v434_v20, %v433_v8 }
  0xc2   :  { %v455_v39 = vmul.f32 1.442695, %v449_v23  ;;  %v442_v40 = vadd.f32 %v441_v27, %v440_v13  ;;  %v552_v41 = vadd.f32 %v551_v29, %v550_v16  ;;  %v557_v42 = vsel %vm39_vm1, %v541_v33, 0.0  ;;  %v697_v23 = vpop.permute.xlu1 %696 }
  0xc3   :  { %v352_v57 = vmul.f32 %v350_v49, %v322_v48  ;;  %v564_v43 = vsel %vm39_vm1, %v542_v34, 0.0  ;;  %v457_v63 = vmul.f32 1.442695, %v450_v30  ;;  %v580_v59 = vrot.slane %v572_v32, 3 }
  0xc4   :  { %v571_v12 = vand.u32 2147483647, %v535_v4  ;;  %v701_v45 = vsel %vm698_vm5, %v691_v36, %v2448_v35  ;;  %v546_v46 = vrot.slane %v545_v28, 2  ;;  %v558_v47 = vrot.slane %v557_v42, 4 }
  0xc5   :  { %v2435_v51 = vadd.f32 %v352_v57, %v2404_v44  ;;  %v451_v44 = vmul.f32 1.442695, %v447_v62  ;;  %v565_v48 = vrot.slane %v564_v43, 4  ;;  %v573_v49 = vand.u32 2147483647, %v537_v25 }
  0xc6   :  { %v423_v50 = vadd.f32 %v422_v37, %v421_v10  ;;  %v436_v52 = vrot.slane %v435_v38, 2  ;;  %v574_v54 = vand.u32 2147483647, %v538_v26  ;;  %v553_v55 = vrot.slane %v552_v41, 2 }
  0xc7   :  { %2133 = vpow2.f32 %v451_v44  ;;  %v559_v56 = vadd.f32 %v558_v47, %v557_v42  ;;  %v566_v53 = vadd.f32 %v565_v48, %v564_v43  ;;  %v2456_v57 = vsub.f32 %v701_v45, %v2290_v3 }
  0xc8   :  { %2135 = vpow2.f32 %v455_v39  ;;  %v443_v58 = vrot.slane %v442_v40, 2  ;;  %v594_v60 = vsel %vm39_vm1, %v580_v59, 0.0  ;;  %v579_v61 = vrot.slane %v571_v12, 3 }
  0xc9   :  { %2137 = vpow2.f32 %v457_v63  ;;  %v547_v62 = vadd.f32 %v546_v46, %v545_v28  ;;  %v560_v4 = vrot.slane %v559_v56, 2  ;;  %v581_v6 = vrot.slane %v573_v49, 3  ;;  %v695_v46 = vpop.permute.xlu0 %694 }
  0xca   :  { %v582_v7 = vrot.slane %v574_v54, 3  ;;  %v430_v8 = vadd.f32 %v429_v31, %v428_v9  ;;  %v567_v10 = vrot.slane %v566_v53, 2  ;;  %v424_v13 = vrot.slane %v423_v50, 1 }
  0xcb   :  { %v554_v14 = vadd.f32 %v553_v55, %v552_v41  ;;  %v708_v15 = vmul.f32 %v2456_v57, %v2456_v57  ;;  %v437_v16 = vadd.f32 %v436_v52, %v435_v38  ;;  %v444_v17 = vadd.f32 %v443_v58, %v442_v40 }
  0xcc   :  { %v595_v3 = vrot.slane %v594_v60, 4  ;;  %v587_v18 = vsel %vm39_vm1, %v579_v61, 0.0  ;;  %v548_v19 = vrot.slane %v547_v62, 1  ;;  %v561_v44 = vadd.f32 %v560_v4, %v559_v56 }
  0xcd   :  { %v601_v20 = vsel %vm39_vm1, %v581_v6, 0.0  ;;  %v608_v21 = vsel %vm39_vm1, %v582_v7, 0.0  ;;  %v2132_v24 = vpop.eup %2131  ;;  %v431_v9 = vrot.slane %v430_v8, 1  ;;  %v568_v25 = vadd.f32 %v567_v10, %v566_v53 }
  0xce   :  { %v2464_v27 = vadd.f32 %v424_v13, %v423_v50  ;;  %v555_v29 = vrot.slane %v554_v14, 1  ;;  %v588_v30 = vrot.slane %v587_v18, 4  ;;  %v718_v32 = vsel %vm39_vm1, %v708_v15, 0.0 }
  0xcf   :  { %v438_v33 = vrot.slane %v437_v16, 1  ;;  %v602_v31 = vrot.slane %v601_v20, 4  ;;  %v609_v28 = vrot.slane %v608_v21, 4  ;;  %v702_v34 = vsel %vm698_vm5, %v697_v23, %v691_v36 }
  0xd0   :  { %v445_v37 = vrot.slane %v444_v17, 1  ;;  %v596_v38 = vadd.f32 %v595_v3, %v594_v60  ;;  %v549_v39 = vadd.f32 %v548_v19, %v547_v62  ;;  %v562_v40 = vrot.slane %v561_v44, 1 }
  0xd1   :  { %v2469_v41 = vadd.f32 %v431_v9, %v430_v8  ;;  %v569_v42 = vrot.slane %v568_v25, 1  ;;  %v719_v43 = vrot.slane %v718_v32, 4  ;;  %v703_v63 = vsub.f32 %v702_v34, %v2278_v1 }
  0xd2   :  { %v556_v12 = vadd.f32 %v555_v29, %v554_v14  ;;  %v589_v45 = vadd.f32 %v588_v30, %v587_v18  ;;  %v2474_v48 = vadd.f32 %v438_v33, %v437_v16  ;;  %v603_v36 = vadd.f32 %v602_v31, %v601_v20 }
  0xd3   :  { %v495_v47 = vcombine.low %v2464_v27, %v2469_v41  ;;  %v610_v49 = vadd.f32 %v609_v28, %v608_v21  ;;  %v446_v52 = vadd.f32 %v445_v37, %v444_v17  ;;  %v597_v54 = vrot.slane %v596_v38, 2  ;;  %v2498_v37 = vpop.permute.xlu1 %860 }
  0xd4   :  { %v2134_v26 = vpop.eup %2133  ;;  %v615_v55 = vmul.f32 -0.005, %v549_v39  ;;  %v563_v56 = vadd.f32 %v562_v40, %v561_v44  ;;  %v570_v53 = vadd.f32 %v569_v42, %v568_v25  ;;  %v720_v58 = vadd.f32 %v719_v43, %v718_v32 }
  0xd5   :  { %v2136_v59 = vpop.eup %2135  ;;  %v707_v60 = vmul.f32 %v703_v63, %v703_v63  ;;  %v699_v1 = vsel %vm698_vm5, %v695_v46, %v697_v23  ;;  %v465_v61 = vcombine.low %v2134_v26, %v2132_v24  ;;  %v616_v62 = vmul.f32 -0.005, %v556_v12 }
  0xd6   :  { %v2138_v50 = vpop.eup %2137  ;;  %v590_v4 = vrot.slane %v589_v45, 2  ;;  %v740_v6 = vand.u32 2147483647, %v2456_v57  ;;  %v604_v7 = vrot.slane %v603_v36, 2  ;;  %v611_v8 = vrot.slane %v610_v49, 2 }
  0xd7   :  { %v700_v10 = vsel %vm698_vm5, %v2448_v35, %v695_v46  ;;  %v2484_v13 = vsub.f32 %v699_v1, %v2285_v2  ;;  %v466_v14 = vcombine.low %v2136_v59, %v2138_v50  ;;  %v598_v15 = vadd.f32 %v597_v54, %v596_v38  ;;  %v859_v38 = vpop.permute.xlu0 %858 }
  0xd8   :  { %v619_v16 = vmul.f32 1.442695, %v615_v55  ;;  %v617_v17 = vmul.f32 -0.005, %v563_v56  ;;  %v618_v3 = vmul.f32 -0.005, %v570_v53  ;;  %v2488_v57 = vsub.f32 %v700_v10, %v2273_v0 }
  0xd9   :  { %v721_v18 = vrot.slane %v720_v58, 2  ;;  %v711_v19 = vsel %vm39_vm1, %v707_v60, 0.0  ;;  %v473_v44 = vrot.slane %v465_v61, %v2348_v22  ;;  %v621_v20 = vmul.f32 1.442695, %v616_v62  ;;  %v2514_v60 = vld [vmem:[%s3055_s1 + $0x8] sm:$0x3f]  ;;  %v865_v62 = vpop.permute.xlu1 %864 }
  0xda   :  { %v591_v21 = vadd.f32 %v590_v4, %v589_v45  ;;  %v748_v23 = vrot.slane %v740_v6, 3  ;;  %v605_v35 = vadd.f32 %v604_v7, %v603_v36  ;;  %v612_v24 = vadd.f32 %v611_v8, %v610_v49  ;;  %v2089_v4 = vld [vmem:[%s3054_s0 + $0x2] ss:$8 sm:$0xf] }
  0xdb   :  { %v739_v2 = vand.u32 2147483647, %v703_v63  ;;  %v710_v9 = vmul.f32 %v2484_v13, %v2484_v13  ;;  %v480_v25 = vrot.slane %v466_v14, %v2348_v22  ;;  %v623_v26 = vmul.f32 1.442695, %v617_v17 }
  0xdc   :  { %v712_v29 = vrot.slane %v711_v19, 4  ;;  %v709_v30 = vmul.f32 %v2488_v57, %v2488_v57  ;;  %v496_v0 = vcombine.low %v2474_v48, %v446_v52  ;;  %2139 = vpow2.f32 %v619_v16 }
  0xdd   :  { %v625_v32 = vmul.f32 1.442695, %v618_v3  ;;  %v722_v33 = vadd.f32 %v721_v18, %v720_v58  ;;  %v599_v31 = vrot.slane %v598_v15, 1  ;;  %2141 = vpow2.f32 %v621_v20 }
  0xde   :  { %v592_v28 = vrot.slane %v591_v21, 1  ;;  %v762_v34 = vsel %vm39_vm1, %v748_v23, 0.0  ;;  %v606_v39 = vrot.slane %v605_v35, 1  ;;  %v613_v40 = vrot.slane %v612_v24, 1 }
  0xdf   :  { %v747_v42 = vrot.slane %v739_v2, 3  ;;  %v732_v43 = vsel %vm39_vm1, %v710_v9, 0.0  ;;  %v481_v63 = vcombine.low %v473_v44, %v480_v25  ;;  %2143 = vpow2.f32 %v623_v26 }
  0xe0   :  { %v713_v59 = vadd.f32 %v712_v29, %v711_v19  ;;  %v725_v12 = vsel %vm39_vm1, %v709_v30, 0.0  ;;  %2145 = vpow2.f32 %v625_v32  ;;  %v723_v45 = vrot.slane %v722_v33, 1  ;;  %v2535_v29 = vld [vmem:[%s3055_s1] sm:$0x3f] }
  0xe1   :  { %v763_v46 = vrot.slane %v762_v34, 4  ;;  %v869_v48 = vsel %vm866_vm6, %v859_v38, %v2498_v37  ;;  %v503_v36 = vrot.slane %v495_v47, %v2348_v22  ;;  %v510_v49 = vrot.slane %v496_v0, %v2348_v22 }
  0xe2   :  { %v593_v50 = vadd.f32 %v592_v28, %v591_v21  ;;  %v733_v52 = vrot.slane %v732_v43, 4  ;;  %v607_v54 = vadd.f32 %v606_v39, %v605_v35  ;;  %v614_v55 = vadd.f32 %v613_v40, %v612_v24 }
  0xe3   :  { %v755_v56 = vsel %vm39_vm1, %v747_v42, 0.0  ;;  %v726_v53 = vrot.slane %v725_v12, 4  ;;  %v714_v58 = vrot.slane %v713_v59, 2  ;;  %v2517_v1 = vsub.f32 %v869_v48, %v2514_v60 }
  0xe4   :  { %v488_v27 = vrot.slane %v481_v63, %v2348_v22  ;;  %v600_v41 = vadd.f32 %v599_v31, %v598_v15  ;;  %v724_v47 = vadd.f32 %v723_v45, %v722_v33  ;;  %v764_v61 = vadd.f32 %v763_v46, %v762_v34  ;;  %v863_v31 = vpop.permute.xlu0 %862 }
  0xe5   :  { %v511_v6 = vcombine.low %v503_v36, %v510_v49  ;;  %v756_v7 = vrot.slane %v755_v56, 4  ;;  %v734_v8 = vadd.f32 %v733_v52, %v732_v43  ;;  %v742_v10 = vand.u32 2147483647, %v2484_v13 }
  0xe6   :  { %v663_v14 = vcombine.low %v593_v50, %v600_v41  ;;  %v664_v16 = vcombine.low %v607_v54, %v614_v55  ;;  %v727_v17 = vadd.f32 %v726_v53, %v725_v12  ;;  %v715_v3 = vadd.f32 %v714_v58, %v713_v59  ;;  %v2558_v58 = vld [vmem:[%s3055_s1 + $0x10] sm:$0x3f] }
  0xe7   :  { %v741_v18 = vand.u32 2147483647, %v2488_v57  ;;  %v876_v15 = vmul.f32 %v2517_v1, %v2517_v1  ;;  %v870_v19 = vsel %vm866_vm6, %v865_v62, %v859_v38  ;;  %v490_v44 = vmul.f32 %v2089_v4, %v488_v27 }
  0xe8   :  { %v765_v20 = vrot.slane %v764_v61, 2  ;;  %v784_v21 = vmul.f32 -0.005, %v724_v47  ;;  %v518_v35 = vrot.slane %v511_v6, %v2348_v22  ;;  %v757_v24 = vadd.f32 %v756_v7, %v755_v56 }
  0xe9   :  { %v2140_v23 = vpop.eup %2139  ;;  %v735_v13 = vrot.slane %v734_v8, 2  ;;  %v750_v2 = vrot.slane %v742_v10, 3  ;;  %v671_v25 = vrot.slane %v663_v14, %v2348_v22  ;;  %v678_v57 = vrot.slane %v664_v16, %v2348_v22  ;;  %v2572_v10 = vpop.permute.xlu1 %1028 }
  0xea   :  { %v2142_v9 = vpop.eup %2141  ;;  %v728_v26 = vrot.slane %v727_v17, 2  ;;  %v2538_v30 = vsub.f32 %v870_v19, %v2535_v29  ;;  %v716_v0 = vrot.slane %v715_v3, 1  ;;  %v749_v32 = vrot.slane %v741_v18, 3 }
  0xeb   :  { %v886_v33 = vsel %vm39_vm1, %v876_v15, 0.0  ;;  %v2541_v34 = vmul.f32 %v518_v35, %v490_v44  ;;  %v633_v38 = vcombine.low %v2140_v23, %v2142_v9  ;;  %v2543_v39 = vadd.f32 %v765_v20, %v764_v61 }
  0xec   :  { %v2144_v28 = vpop.eup %2143  ;;  %v789_v40 = vmul.f32 1.442695, %v784_v21  ;;  %v758_v43 = vrot.slane %v757_v24, 2  ;;  %v736_v63 = vadd.f32 %v735_v13, %v734_v8  ;;  %v776_v59 = vsel %vm39_vm1, %v750_v2, 0.0 }
  0xed   :  { %v2146_v42 = vpop.eup %2145  ;;  %v875_v12 = vmul.f32 %v2538_v30, %v2538_v30  ;;  %v679_v45 = vcombine.low %v671_v25, %v678_v57  ;;  %v729_v46 = vadd.f32 %v728_v26, %v727_v17  ;;  %v887_v48 = vrot.slane %v886_v33, 4 }
  0xee   :  { %v867_v36 = vsel %vm866_vm6, %v863_v31, %v865_v62  ;;  %v717_v49 = vadd.f32 %v716_v0, %v715_v3  ;;  %v769_v50 = vsel %vm39_vm1, %v749_v32, 0.0  ;;  %v868_v54 = vsel %vm866_vm6, %v2498_v37, %v863_v31  ;;  %v2567_v62 = vld [vmem:[%s3055_s1 + $0x18] sm:$0x3f]  ;;  %v1027_v31 = vpop.permute.xlu0 %1026 }
  0xef   :  { %v879_v52 = vsel %vm39_vm1, %v875_v12, 0.0  ;;  %v634_v55 = vcombine.low %v2144_v28, %v2146_v42  ;;  %v777_v56 = vrot.slane %v776_v59, 4  ;;  %v2561_v27 = vsub.f32 %v868_v54, %v2558_v58  ;;  %v2588_v28 = vpop.permute.xlu1 %1032 }
  0xf0   :  { %v880_v53 = vrot.slane %v879_v52, 4  ;;  %v767_v41 = vrot.slane %v2543_v39, 1  ;;  %v759_v47 = vadd.f32 %v758_v43, %v757_v24  ;;  %v737_v61 = vrot.slane %v736_v63, 1 }
  0xf1   :  { %v2570_v37 = vsub.f32 %v867_v36, %v2567_v62  ;;  %v730_v4 = vrot.slane %v729_v46, 1  ;;  %v770_v6 = vrot.slane %v769_v50, 4  ;;  %v888_v7 = vadd.f32 %v887_v48, %v886_v33 }
  0xf2   :  { %v881_v8 = vadd.f32 %v880_v53, %v879_v52  ;;  %2147 = vpow2.f32 %v789_v40  ;;  %v783_v14 = vmul.f32 -0.005, %v717_v49  ;;  %v877_v16 = vmul.f32 %v2561_v27, %v2561_v27  ;;  %v2090_v53 = vld [vmem:[%s3054_s0 + $0x3] ss:$8 sm:$0xf] }
  0xf3   :  { %v878_v17 = vmul.f32 %v2570_v37, %v2570_v37  ;;  %v641_v3 = vrot.slane %v633_v38, %v2348_v22  ;;  %v648_v18 = vrot.slane %v634_v55, %v2348_v22  ;;  %v2581_v15 = vrot.slane %v679_v45, %v2348_v22 }
  0xf4   :  { %v778_v19 = vadd.f32 %v777_v56, %v776_v59  ;;  %v738_v44 = vadd.f32 %v737_v61, %v736_v63  ;;  %v882_v20 = vrot.slane %v881_v8, 2  ;;  %v893_v21 = vsel %vm39_vm1, %v877_v16, 0.0 }
  0xf5   :  { %v900_v23 = vsel %vm39_vm1, %v878_v17, 0.0  ;;  %v760_v35 = vrot.slane %v759_v47, 1  ;;  %v731_v24 = vadd.f32 %v730_v4, %v729_v46  ;;  %v771_v13 = vadd.f32 %v770_v6, %v769_v50 }
  0xf6   :  { %v889_v2 = vrot.slane %v888_v7, 2  ;;  %v787_v9 = vmul.f32 1.442695, %v783_v14  ;;  %v908_v25 = vand.u32 2147483647, %v2517_v1  ;;  %v894_v57 = vrot.slane %v893_v21, 4 }
  0xf7   :  { %v901_v26 = vrot.slane %v900_v23, 4  ;;  %v649_v0 = vcombine.low %v641_v3, %v648_v18  ;;  %v779_v32 = vrot.slane %v778_v19, 2  ;;  %v907_v33 = vand.u32 2147483647, %v2538_v30 }
  0xf8   :  { %v786_v38 = vmul.f32 -0.005, %v738_v44  ;;  %v883_v40 = vadd.f32 %v882_v20, %v881_v8  ;;  %v895_v42 = vadd.f32 %v894_v57, %v893_v21  ;;  %v761_v63 = vadd.f32 %v760_v35, %v759_v47 }
  0xf9   :  { %v902_v43 = vadd.f32 %v901_v26, %v900_v23  ;;  %v772_v59 = vrot.slane %v771_v13, 2  ;;  %v785_v12 = vmul.f32 -0.005, %v731_v24  ;;  %v890_v45 = vadd.f32 %v889_v2, %v888_v7 }
  0xfa   :  { %v916_v1 = vrot.slane %v908_v25, 3  ;;  %v896_v46 = vrot.slane %v895_v42, 2  ;;  %v1037_v48 = vsel %vm1034_vm7, %v1027_v31, %v2572_v10  ;;  %v1038_v30 = vsel %vm1034_vm7, %v2588_v28, %v1027_v31 }
  0xfb   :  { %v768_v36 = vadd.f32 %v767_v41, %v2543_v39  ;;  %2149 = vpow2.f32 %v787_v9  ;;  %v915_v49 = vrot.slane %v907_v33, 3  ;;  %v903_v50 = vrot.slane %v902_v43, 2 }
  0xfc   :  { %v656_v52 = vrot.slane %v649_v0, %v2348_v22  ;;  %v780_v54 = vadd.f32 %v779_v32, %v778_v19  ;;  %v793_v55 = vmul.f32 1.442695, %v786_v38  ;;  %v884_v56 = vrot.slane %v883_v40, 1 }
  0xfd   :  { %v831_v47 = vcombine.low %v761_v63, %v768_v36  ;;  %v891_v61 = vrot.slane %v890_v45, 1  ;;  %v2602_v4 = vsub.f32 %v1037_v48, %v2514_v60  ;;  %v2605_v6 = vsub.f32 %v1038_v30, %v2535_v29 }
  0xfe   :  { %v773_v39 = vadd.f32 %v772_v59, %v771_v13  ;;  %v791_v41 = vmul.f32 1.442695, %v785_v12  ;;  %v930_v7 = vsel %vm39_vm1, %v916_v1, 0.0  ;;  %v897_v8 = vadd.f32 %v896_v46, %v895_v42  ;;  %v1031_v42 = vpop.permute.xlu0 %1030 }
  0xff   :  { %v2608_v14 = vpop.eup %2147  ;;  %v923_v16 = vsel %vm39_vm1, %v915_v49, 0.0  ;;  %v904_v17 = vadd.f32 %v903_v50, %v902_v43  ;;  %v909_v3 = vand.u32 2147483647, %v2561_v27  ;;  %v910_v18 = vand.u32 2147483647, %v2570_v37 }
 0x100   :  { %v658_v19 = vmul.f32 %v2090_v53, %v656_v52  ;;  %v781_v44 = vrot.slane %v780_v54, 1  ;;  %2151 = vpow2.f32 %v793_v55  ;;  %v885_v20 = vadd.f32 %v884_v56, %v883_v40 }
 0x101   :  { %v892_v21 = vadd.f32 %v891_v61, %v890_v45  ;;  %v931_v23 = vrot.slane %v930_v7, 4  ;;  %v1044_v35 = vmul.f32 %v2602_v4, %v2602_v4  ;;  %v1043_v24 = vmul.f32 %v2605_v6, %v2605_v6 }
 0x102   :  { %v774_v13 = vrot.slane %v773_v39, 1  ;;  %2153 = vpow2.f32 %v791_v41  ;;  %v924_v2 = vrot.slane %v923_v16, 4  ;;  %v898_v9 = vrot.slane %v897_v8, 1 }
 0x103   :  { %v905_v25 = vrot.slane %v904_v17, 1  ;;  %v917_v27 = vrot.slane %v909_v3, 3  ;;  %v918_v57 = vrot.slane %v910_v18, 3  ;;  %v1047_v37 = vsel %vm39_vm1, %v1043_v24, 0.0 }
 0x104   :  { %v521_v26 = vadd.f32 %v2541_v34, %v2435_v51  ;;  %v2621_v0 = vrot.slane %v831_v47, %v2348_v22  ;;  %v951_v32 = vmul.f32 -0.005, %v885_v20  ;;  %v688_v33 = vmul.f32 %v2581_v15, %v658_v19 }
 0x105   :  { %v932_v31 = vadd.f32 %v931_v23, %v930_v7  ;;  %v952_v38 = vmul.f32 -0.005, %v892_v21  ;;  %v1054_v40 = vsel %vm39_vm1, %v1044_v35, 0.0  ;;  %v782_v43 = vadd.f32 %v781_v44, %v780_v54 }
 0x106   :  { %v925_v63 = vadd.f32 %v924_v2, %v923_v16  ;;  %v899_v59 = vadd.f32 %v898_v9, %v897_v8  ;;  %v1048_v12 = vrot.slane %v1047_v37, 4  ;;  %v775_v45 = vadd.f32 %v774_v13, %v773_v39 }
 0x107   :  { %v906_v1 = vadd.f32 %v905_v25, %v904_v17  ;;  %v937_v46 = vsel %vm39_vm1, %v917_v27, 0.0  ;;  %v944_v51 = vsel %vm39_vm1, %v918_v57, 0.0  ;;  %v955_v48 = vmul.f32 1.442695, %v951_v32  ;;  %v2653_v32 = vpop.permute.xlu1 %1196 }
 0x108   :  { %v2150_v34 = vpop.eup %2149  ;;  %v1055_v30 = vrot.slane %v1054_v40, 4  ;;  %v1035_v15 = vsel %vm1034_vm7, %v1031_v42, %v2588_v28  ;;  %v1036_v36 = vsel %vm1034_vm7, %v2572_v10, %v1031_v42  ;;  %v2633_v49 = vadd.f32 %v688_v33, %v521_v26 }
 0x109   :  { %v933_v50 = vrot.slane %v932_v31, 2  ;;  %v957_v52 = vmul.f32 1.442695, %v952_v38  ;;  %v2636_v54 = vsub.f32 %v1036_v36, %v2558_v58  ;;  %v926_v55 = vrot.slane %v925_v63, 2 }
 0x10a   :  { %v953_v56 = vmul.f32 -0.005, %v899_v59  ;;  %v1049_v53 = vadd.f32 %v1048_v12, %v1047_v37  ;;  %v2639_v47 = vsub.f32 %v1035_v15, %v2567_v62  ;;  %v938_v61 = vrot.slane %v937_v46, 4 }
 0x10b   :  { %v945_v39 = vrot.slane %v944_v51, 4  ;;  %v954_v28 = vmul.f32 -0.005, %v906_v1  ;;  %v1045_v41 = vmul.f32 %v2636_v54, %v2636_v54  ;;  %2155 = vpow2.f32 %v955_v48 }
 0x10c   :  { %v1056_v10 = vadd.f32 %v1055_v30, %v1054_v40  ;;  %v1076_v7 = vand.u32 2147483647, %v2602_v4  ;;  %v1046_v8 = vmul.f32 %v2639_v47, %v2639_v47  ;;  %v832_v17 = vcombine.low %v775_v45, %v782_v43 }
 0x10d   :  { %v2152_v16 = vpop.eup %2151  ;;  %2157 = vpow2.f32 %v957_v52  ;;  %v1075_v3 = vand.u32 2147483647, %v2605_v6  ;;  %v1061_v18 = vsel %vm39_vm1, %v1045_v41, 0.0  ;;  %v927_v19 = vadd.f32 %v926_v55, %v925_v63 }
 0x10e   :  { %v959_v44 = vmul.f32 1.442695, %v953_v56  ;;  %v1050_v20 = vrot.slane %v1049_v53, 2  ;;  %v1062_v21 = vrot.slane %v1061_v18, 4  ;;  %v939_v35 = vadd.f32 %v938_v61, %v937_v46  ;;  %v1201_v56 = vpop.permute.xlu1 %1200 }
 0x10f   :  { %v2154_v23 = vpop.eup %2153  ;;  %v946_v24 = vadd.f32 %v945_v39, %v944_v51  ;;  %v961_v13 = vmul.f32 1.442695, %v954_v28  ;;  %v1068_v4 = vsel %vm39_vm1, %v1046_v8, 0.0  ;;  %v934_v2 = vadd.f32 %v933_v50, %v932_v31 }
 0x110   :  { %v1057_v9 = vrot.slane %v1056_v10, 2  ;;  %v1084_v25 = vrot.slane %v1076_v7, 3  ;;  %v1069_v27 = vrot.slane %v1068_v4, 4  ;;  %v801_v57 = vcombine.low %v2150_v34, %v2608_v14  ;;  %v1195_v14 = vpop.permute.xlu0 %1194 }
 0x111   :  { %v2651_v6 = vrot.slane %v832_v17, %v2348_v22  ;;  %v1083_v37 = vrot.slane %v1075_v3, 3  ;;  %v1063_v26 = vadd.f32 %v1062_v21, %v1061_v18  ;;  %v928_v33 = vrot.slane %v927_v19, 1 }
 0x112   :  { %2159 = vpow2.f32 %v959_v44  ;;  %v1051_v38 = vadd.f32 %v1050_v20, %v1049_v53  ;;  %v1070_v40 = vadd.f32 %v1069_v27, %v1068_v4  ;;  %v802_v42 = vcombine.low %v2154_v23, %v2152_v16 }
 0x113   :  { %v940_v43 = vrot.slane %v939_v35, 2  ;;  %v947_v63 = vrot.slane %v946_v24, 2  ;;  %2161 = vpow2.f32 %v961_v13  ;;  %v935_v31 = vrot.slane %v934_v2, 1 }
 0x114   :  { %v1058_v59 = vadd.f32 %v1057_v9, %v1056_v10  ;;  %v1098_v12 = vsel %vm39_vm1, %v1084_v25, 0.0  ;;  %v1091_v45 = vsel %vm39_vm1, %v1083_v37, 0.0  ;;  %v1064_v1 = vrot.slane %v1063_v26, 2 }
 0x115   :  { %v1077_v46 = vand.u32 2147483647, %v2636_v54  ;;  %v1078_v51 = vand.u32 2147483647, %v2639_v47  ;;  %v809_v34 = vrot.slane %v801_v57, %v2348_v22  ;;  %v929_v48 = vadd.f32 %v928_v33, %v927_v19 }
 0x116   :  { %v1052_v30 = vrot.slane %v1051_v38, 1  ;;  %v1071_v15 = vrot.slane %v1070_v40, 2  ;;  %v816_v36 = vrot.slane %v802_v42, %v2348_v22  ;;  %v941_v50 = vadd.f32 %v940_v43, %v939_v35 }
 0x117   :  { %v948_v52 = vadd.f32 %v947_v63, %v946_v24  ;;  %v1205_v55 = vsel %vm1202_vm8, %v1195_v14, %v2653_v32  ;;  %v847_v53 = vcombine.low %v2621_v0, %v2651_v6  ;;  %v1059_v54 = vrot.slane %v1058_v59, 1 }
 0x118   :  { %v1099_v61 = vrot.slane %v1098_v12, 4  ;;  %v1092_v47 = vrot.slane %v1091_v45, 4  ;;  %v2156_v39 = vpop.eup %2155  ;;  %v936_v28 = vadd.f32 %v935_v31, %v934_v2  ;;  %v1065_v41 = vadd.f32 %v1064_v1, %v1063_v26 }
 0x119   :  { %v1085_v10 = vrot.slane %v1077_v46, 3  ;;  %v1086_v7 = vrot.slane %v1078_v51, 3  ;;  %v1053_v16 = vadd.f32 %v1052_v30, %v1051_v38  ;;  %v1072_v17 = vadd.f32 %v1071_v15, %v1070_v40 }
 0x11a   :  { %v2158_v8 = vpop.eup %2157  ;;  %v1208_v3 = vsub.f32 %v1205_v55, %v2514_v60  ;;  %v1206_v18 = vsel %vm1202_vm8, %v1201_v56, %v1195_v14  ;;  %v817_v19 = vcombine.low %v809_v34, %v816_v36  ;;  %v999_v44 = vcombine.low %v929_v48, %v936_v28 }
 0x11b   :  { %v942_v20 = vrot.slane %v941_v50, 1  ;;  %v949_v21 = vrot.slane %v948_v52, 1  ;;  %v969_v23 = vcombine.low %v2156_v39, %v2158_v8  ;;  %v1060_v35 = vadd.f32 %v1059_v54, %v1058_v59 }
 0x11c   :  { %v1100_v24 = vadd.f32 %v1099_v61, %v1098_v12  ;;  %v1093_v13 = vadd.f32 %v1092_v47, %v1091_v45  ;;  %v1066_v4 = vrot.slane %v1065_v41, 1  ;;  %v1105_v2 = vsel %vm39_vm1, %v1085_v10, 0.0  ;;  %v1199_v45 = vpop.permute.xlu0 %1198 }
 0x11d   :  { %v1112_v9 = vsel %vm39_vm1, %v1086_v7, 0.0  ;;  %v1207_v25 = vsub.f32 %v1206_v18, %v2535_v29  ;;  %v1119_v27 = vmul.f32 -0.005, %v1053_v16  ;;  %v1073_v57 = vrot.slane %v1072_v17, 1 }
 0x11e   :  { %v1212_v37 = vmul.f32 %v1208_v3, %v1208_v3  ;;  %v1244_v26 = vand.u32 2147483647, %v1208_v3  ;;  %v2674_v38 = vrot.slane %v817_v19, %v2348_v22  ;;  %v2677_v40 = vrot.slane %v999_v44, %v2348_v22 }
 0x11f   :  { %v2160_v33 = vpop.eup %2159  ;;  %v943_v42 = vadd.f32 %v942_v20, %v941_v50  ;;  %v950_v43 = vadd.f32 %v949_v21, %v948_v52  ;;  %v1101_v31 = vrot.slane %v1100_v24, 2  ;;  %v1106_v59 = vrot.slane %v1105_v2, 4 }
 0x120   :  { %v2162_v63 = vpop.eup %2161  ;;  %v1113_v12 = vrot.slane %v1112_v9, 4  ;;  %v1211_v14 = vmul.f32 %v1207_v25, %v1207_v25  ;;  %v2680_v1 = vrot.slane %v969_v23, %v2348_v22  ;;  %v1120_v46 = vmul.f32 -0.005, %v1060_v35 }
 0x121   :  { %v1094_v51 = vrot.slane %v1093_v13, 2  ;;  %v1067_v34 = vadd.f32 %v1066_v4, %v1065_v41  ;;  %v1123_v48 = vmul.f32 1.442695, %v1119_v27  ;;  %v1074_v30 = vadd.f32 %v1073_v57, %v1072_v17 }
 0x122   :  { %v1222_v15 = vsel %vm39_vm1, %v1212_v37, 0.0  ;;  %v1252_v36 = vrot.slane %v1244_v26, 3  ;;  %v970_v55 = vcombine.low %v2160_v33, %v2162_v63  ;;  %v1243_v50 = vand.u32 2147483647, %v1207_v25  ;;  %v2704_v63 = vpop.permute.xlu1 %1364 }
 0x123   :  { %v1203_v52 = vsel %vm1202_vm8, %v1199_v45, %v1201_v56  ;;  %v1204_v54 = vsel %vm1202_vm8, %v2653_v32, %v1199_v45  ;;  %v1107_v61 = vadd.f32 %v1106_v59, %v1105_v2  ;;  %v1114_v47 = vadd.f32 %v1113_v12, %v1112_v9  ;;  %v1363_v59 = vpop.permute.xlu0 %1362 }
 0x124   :  { %v1215_v39 = vsel %vm39_vm1, %v1211_v14, 0.0  ;;  %v2690_v28 = vsub.f32 %v1204_v54, %v2558_v58  ;;  %v1125_v41 = vmul.f32 1.442695, %v1120_v46  ;;  %v1095_v10 = vadd.f32 %v1094_v51, %v1093_v13  ;;  %v2092_v54 = vld [vmem:[%s3054_s0 + $0x5] ss:$8 sm:$0xf] }
 0x125   :  { %v1121_v7 = vmul.f32 -0.005, %v1067_v34  ;;  %v1223_v8 = vrot.slane %v1222_v15, 4  ;;  %v1122_v16 = vmul.f32 -0.005, %v1074_v30  ;;  %v1266_v17 = vsel %vm39_vm1, %v1252_v36, 0.0 }
 0x126   :  { %v2694_v56 = vsub.f32 %v1203_v52, %v2567_v62  ;;  %v1213_v32 = vmul.f32 %v2690_v28, %v2690_v28  ;;  %v984_v3 = vrot.slane %v970_v55, %v2348_v22  ;;  %2163 = vpow2.f32 %v1123_v48 }
 0x127   :  { %v1216_v18 = vrot.slane %v1215_v39, 4  ;;  %v1251_v19 = vrot.slane %v1243_v50, 3  ;;  %v1108_v44 = vrot.slane %v1107_v61, 2  ;;  %v1115_v20 = vrot.slane %v1114_v47, 2 }
 0x128   :  { %v1214_v21 = vmul.f32 %v2694_v56, %v2694_v56  ;;  %v1229_v23 = vsel %vm39_vm1, %v1213_v32, 0.0  ;;  %v1000_v35 = vcombine.low %v943_v42, %v950_v43  ;;  %v1102_v13 = vadd.f32 %v1101_v31, %v1100_v24  ;;  %v2091_v24 = vld [vmem:[%s3054_s0 + $0x4] ss:$8 sm:$0xf] }
 0x129   :  { %v1224_v4 = vadd.f32 %v1223_v8, %v1222_v15  ;;  %v1267_v2 = vrot.slane %v1266_v17, 4  ;;  %2165 = vpow2.f32 %v1125_v41  ;;  %v1096_v9 = vrot.slane %v1095_v10, 1 }
 0x12a   :  { %v1127_v25 = vmul.f32 1.442695, %v1121_v7  ;;  %v1129_v27 = vmul.f32 1.442695, %v1122_v16  ;;  %v1217_v57 = vadd.f32 %v1216_v18, %v1215_v39  ;;  %v1259_v37 = vsel %vm39_vm1, %v1251_v19, 0.0  ;;  %v1369_v18 = vpop.permute.xlu1 %1368 }
 0x12b   :  { %v1230_v26 = vrot.slane %v1229_v23, 4  ;;  %v1236_v33 = vsel %vm39_vm1, %v1214_v21, 0.0  ;;  %v985_v12 = vcombine.low %v2680_v1, %v984_v3  ;;  %v1109_v14 = vadd.f32 %v1108_v44, %v1107_v61 }
 0x12c   :  { %v1116_v42 = vadd.f32 %v1115_v20, %v1114_v47  ;;  %v1014_v43 = vrot.slane %v1000_v35, %v2348_v22  ;;  %v1103_v31 = vrot.slane %v1102_v13, 1  ;;  %v1225_v45 = vrot.slane %v1224_v4, 2 }
 0x12d   :  { %v1268_v46 = vadd.f32 %v1267_v2, %v1266_v17  ;;  %2167 = vpow2.f32 %v1127_v25  ;;  %v1260_v51 = vrot.slane %v1259_v37, 4  ;;  %v1237_v34 = vrot.slane %v1236_v33, 4 }
 0x12e   :  { %v1373_v1 = vsel %vm1370_vm9, %v1363_v59, %v2704_v63  ;;  %v1097_v48 = vadd.f32 %v1096_v9, %v1095_v10  ;;  %2169 = vpow2.f32 %v1129_v27  ;;  %v1218_v30 = vrot.slane %v1217_v57, 2 }
 0x12f   :  { %v1231_v15 = vadd.f32 %v1230_v26, %v1229_v23  ;;  %v826_v36 = vmul.f32 %v2091_v24, %v2674_v38  ;;  %v992_v55 = vrot.slane %v985_v12, %v2348_v22  ;;  %v1110_v50 = vrot.slane %v1109_v14, 1 }
 0x130   :  { %v1117_v52 = vrot.slane %v1116_v42, 1  ;;  %v1104_v61 = vadd.f32 %v1103_v31, %v1102_v13  ;;  %v1226_v47 = vadd.f32 %v1225_v45, %v1224_v4  ;;  %v1269_v39 = vrot.slane %v1268_v46, 2 }
 0x131   :  { %v2721_v41 = vsub.f32 %v1373_v1, %v2514_v60  ;;  %v854_v10 = vrot.slane %v847_v53, %v2348_v22  ;;  %v1015_v38 = vcombine.low %v2677_v40, %v1014_v43  ;;  %v1261_v7 = vadd.f32 %v1260_v51, %v1259_v37  ;;  %v1367_v37 = vpop.permute.xlu0 %1366 }
 0x132   :  { %v1238_v8 = vadd.f32 %v1237_v34, %v1236_v33  ;;  %v1167_v16 = vcombine.low %v1097_v48, %v1104_v61  ;;  %v1219_v17 = vadd.f32 %v1218_v30, %v1217_v57  ;;  %v1232_v32 = vrot.slane %v1231_v15, 2 }
 0x133   :  { %v1245_v3 = vand.u32 2147483647, %v2690_v28  ;;  %v2164_v19 = vpop.eup %2163  ;;  %v2729_v44 = vmul.f32 %v854_v10, %v826_v36  ;;  %v994_v20 = vmul.f32 %v2092_v54, %v992_v55  ;;  %v1111_v21 = vadd.f32 %v1110_v50, %v1109_v14 }
 0x134   :  { %v1118_v23 = vadd.f32 %v1117_v52, %v1116_v42  ;;  %v1227_v35 = vrot.slane %v1226_v47, 1  ;;  %v1270_v13 = vadd.f32 %v1269_v39, %v1268_v46  ;;  %v1246_v0 = vand.u32 2147483647, %v2694_v56 }
 0x135   :  { %v1380_v6 = vmul.f32 %v2721_v41, %v2721_v41  ;;  %v1022_v53 = vrot.slane %v1015_v38, %v2348_v22  ;;  %v1262_v40 = vrot.slane %v1261_v7, 2  ;;  %v1239_v4 = vrot.slane %v1238_v8, 2 }
 0x136   :  { %v1374_v28 = vsel %vm1370_vm9, %v1369_v18, %v1363_v59  ;;  %v2166_v2 = vpop.eup %2165  ;;  %v2738_v9 = vrot.slane %v1167_v16, %v2348_v22  ;;  %v1220_v25 = vrot.slane %v1219_v17, 1  ;;  %v1233_v27 = vadd.f32 %v1232_v32, %v1231_v15 }
 0x137   :  { %v1253_v57 = vrot.slane %v1245_v3, 3  ;;  %v2740_v26 = vmul.f32 %v1022_v53, %v994_v20  ;;  %v1137_v56 = vcombine.low %v2164_v19, %v2166_v2  ;;  %v1168_v33 = vcombine.low %v1111_v21, %v1118_v23 }
 0x138   :  { %v1375_v12 = vsub.f32 %v1374_v28, %v2535_v29  ;;  %v1228_v14 = vadd.f32 %v1227_v35, %v1226_v47  ;;  %v1271_v42 = vrot.slane %v1270_v13, 1  ;;  %v1254_v24 = vrot.slane %v1246_v0, 3 }
 0x139   :  { %v1390_v43 = vsel %vm39_vm1, %v1380_v6, 0.0  ;;  %v1263_v59 = vadd.f32 %v1262_v40, %v1261_v7  ;;  %v1240_v31 = vadd.f32 %v1239_v4, %v1238_v8  ;;  %v1371_v46 = vsel %vm1370_vm9, %v1367_v37, %v1369_v18 }
 0x13a   :  { %v1379_v45 = vmul.f32 %v1375_v12, %v1375_v12  ;;  %v2168_v51 = vpop.eup %2167  ;;  %v1221_v34 = vadd.f32 %v1220_v25, %v1219_v17  ;;  %v1234_v1 = vrot.slane %v1233_v27, 1  ;;  %v1273_v48 = vsel %vm39_vm1, %v1253_v57, 0.0 }
 0x13b   :  { %v1372_v30 = vsel %vm1370_vm9, %v2704_v63, %v1367_v37  ;;  %v2170_v15 = vpop.eup %2169  ;;  %v2751_v36 = vrot.slane %v1137_v56, %v2348_v22  ;;  %v1391_v55 = vrot.slane %v1390_v43, 4  ;;  %v1288_v54 = vmul.f32 -0.005, %v1228_v14  ;;  %v2770_v56 = vpop.permute.xlu1 %1532 }
 0x13c   :  { %v1383_v50 = vsel %vm39_vm1, %v1379_v45, 0.0  ;;  %v1377_v52 = vsub.f32 %v1372_v30, %v2558_v58  ;;  %v1280_v61 = vsel %vm39_vm1, %v1254_v24, 0.0  ;;  %v1378_v39 = vsub.f32 %v1371_v46, %v2567_v62 }
 0x13d   :  { %v1384_v47 = vrot.slane %v1383_v50, 4  ;;  %v1264_v10 = vrot.slane %v1263_v59, 1  ;;  %v1241_v38 = vrot.slane %v1240_v31, 1  ;;  %v1274_v7 = vrot.slane %v1273_v48, 4 }
 0x13e   :  { %v1381_v8 = vmul.f32 %v1377_v52, %v1377_v52  ;;  %v1138_v63 = vcombine.low %v2168_v51, %v2170_v15  ;;  %v1287_v16 = vmul.f32 -0.005, %v1221_v34  ;;  %v1235_v17 = vadd.f32 %v1234_v1, %v1233_v27 }
 0x13f   :  { %v1385_v32 = vadd.f32 %v1384_v47, %v1383_v50  ;;  %v1392_v3 = vadd.f32 %v1391_v55, %v1390_v43  ;;  %v1412_v18 = vand.u32 2147483647, %v2721_v41  ;;  %v1411_v19 = vand.u32 2147483647, %v1375_v12 }
 0x140   :  { %v1382_v20 = vmul.f32 %v1378_v39, %v1378_v39  ;;  %v2759_v21 = vrot.slane %v1168_v33, %v2348_v22  ;;  %v2761_v23 = vadd.f32 %v1271_v42, %v1270_v13  ;;  %v1293_v35 = vmul.f32 1.442695, %v1288_v54  ;;  %v1531_v42 = vpop.permute.xlu0 %1530 }
 0x141   :  { %v1386_v0 = vrot.slane %v1385_v32, 2  ;;  %v2763_v6 = vadd.f32 %v1264_v10, %v1263_v59  ;;  %v1242_v53 = vadd.f32 %v1241_v38, %v1240_v31  ;;  %v1281_v40 = vrot.slane %v1280_v61, 4  ;;  %v1537_v10 = vpop.permute.xlu1 %1536 }
 0x142   :  { %v1397_v4 = vsel %vm39_vm1, %v1381_v8, 0.0  ;;  %v2767_v28 = vrot.slane %v1138_v63, %v2348_v22  ;;  %v1291_v2 = vmul.f32 1.442695, %v1287_v16  ;;  %v1275_v41 = vadd.f32 %v1274_v7, %v1273_v48 }
 0x143   :  { %v1404_v25 = vsel %vm39_vm1, %v1382_v20, 0.0  ;;  %v1289_v27 = vmul.f32 -0.005, %v1235_v17  ;;  %v1393_v57 = vrot.slane %v1392_v3, 2  ;;  %v1420_v37 = vrot.slane %v1412_v18, 3 }
 0x144   :  { %v1419_v13 = vrot.slane %v1411_v19, 3  ;;  %v1387_v33 = vadd.f32 %v1386_v0, %v1385_v32  ;;  %v1398_v12 = vrot.slane %v1397_v4, 4  ;;  %v1413_v14 = vand.u32 2147483647, %v1377_v52 }
 0x145   :  { %2171 = vpow2.f32 %v1293_v35  ;;  %v1290_v24 = vmul.f32 -0.005, %v1242_v53  ;;  %v1405_v43 = vrot.slane %v1404_v25, 4  ;;  %v1414_v59 = vand.u32 2147483647, %v1378_v39 }
 0x146   :  { %v1153_v31 = vcombine.low %v2751_v36, %v2767_v28  ;;  %v1335_v45 = vcombine.low %v2763_v6, %v2761_v23  ;;  %v1276_v46 = vrot.slane %v1275_v41, 2  ;;  %v1282_v51 = vadd.f32 %v1281_v40, %v1280_v61 }
 0x147   :  { %v1295_v34 = vmul.f32 1.442695, %v1289_v27  ;;  %v1394_v1 = vadd.f32 %v1393_v57, %v1392_v3  ;;  %v1434_v48 = vsel %vm39_vm1, %v1420_v37, 0.0  ;;  %v1541_v30 = vsel %vm1538_vm10, %v1531_v42, %v2770_v56 }
 0x148   :  { %v1388_v15 = vrot.slane %v1387_v33, 1  ;;  %v1427_v55 = vsel %vm39_vm1, %v1419_v13, 0.0  ;;  %v1399_v50 = vadd.f32 %v1398_v12, %v1397_v4  ;;  %v1421_v52 = vrot.slane %v1413_v14, 3  ;;  %v1535_v12 = vpop.permute.xlu0 %1534 }
 0x149   :  { %v1297_v54 = vmul.f32 1.442695, %v1290_v24  ;;  %v1406_v36 = vadd.f32 %v1405_v43, %v1404_v25  ;;  %v1422_v47 = vrot.slane %v1414_v59, 3  ;;  %v1544_v39 = vsub.f32 %v1541_v30, %v2514_v60 }
 0x14a   :  { %2173 = vpow2.f32 %v1291_v2  ;;  %v1277_v61 = vadd.f32 %v1276_v46, %v1275_v41  ;;  %v1283_v38 = vrot.slane %v1282_v51, 2  ;;  %v1435_v7 = vrot.slane %v1434_v48, 4 }
 0x14b   :  { %2175 = vpow2.f32 %v1295_v34  ;;  %v1395_v8 = vrot.slane %v1394_v1, 1  ;;  %v1428_v63 = vrot.slane %v1427_v55, 4  ;;  %v1548_v16 = vmul.f32 %v1544_v39, %v1544_v39 }
 0x14c   :  { %v1389_v17 = vadd.f32 %v1388_v15, %v1387_v33  ;;  %v1400_v32 = vrot.slane %v1399_v50, 2  ;;  %v1441_v3 = vsel %vm39_vm1, %v1421_v52, 0.0  ;;  %v1542_v18 = vsel %vm1538_vm10, %v1537_v10, %v1531_v42 }
 0x14d   :  { %2177 = vpow2.f32 %v1297_v54  ;;  %v1407_v19 = vrot.slane %v1406_v36, 2  ;;  %v1448_v60 = vsel %vm39_vm1, %v1422_v47, 0.0  ;;  %v1558_v20 = vsel %vm39_vm1, %v1548_v16, 0.0 }
 0x14e   :  { %v1284_v23 = vadd.f32 %v1283_v38, %v1282_v51  ;;  %v1436_v35 = vadd.f32 %v1435_v7, %v1434_v48  ;;  %v1559_v0 = vrot.slane %v1558_v20, 4  ;;  %v1580_v6 = vand.u32 2147483647, %v1544_v39 }
 0x14f   :  { %v1396_v53 = vadd.f32 %v1395_v8, %v1394_v1  ;;  %v1429_v40 = vadd.f32 %v1428_v63, %v1427_v55  ;;  %v1442_v4 = vrot.slane %v1441_v3, 4  ;;  %v1543_v28 = vsub.f32 %v1542_v18, %v2535_v29 }
 0x150   :  { %v1455_v41 = vmul.f32 -0.005, %v1389_v17  ;;  %v1401_v25 = vadd.f32 %v1400_v32, %v1399_v50  ;;  %v1449_v27 = vrot.slane %v1448_v60, 4  ;;  %v2792_v57 = vrot.slane %v1153_v31, %v2348_v22 }
 0x151   :  { %v2795_v37 = vrot.slane %v1335_v45, %v2348_v22  ;;  %v1408_v13 = vadd.f32 %v1407_v19, %v1406_v36  ;;  %v1547_v33 = vmul.f32 %v1543_v28, %v1543_v28  ;;  %v1278_v42 = vrot.slane %v1277_v61, 1 }
 0x152   :  { %v2172_v14 = vpop.eup %2171  ;;  %v1285_v24 = vrot.slane %v1284_v23, 1  ;;  %v1560_v43 = vadd.f32 %v1559_v0, %v1558_v20  ;;  %v1588_v29 = vrot.slane %v1580_v6, 3  ;;  %v1437_v59 = vrot.slane %v1436_v35, 2 }
 0x153   :  { %v1456_v46 = vmul.f32 -0.005, %v1396_v53  ;;  %v1430_v51 = vrot.slane %v1429_v40, 2  ;;  %v1443_v34 = vadd.f32 %v1442_v4, %v1441_v3  ;;  %v1459_v1 = vmul.f32 1.442695, %v1455_v41  ;;  %v2820_v53 = vpop.permute.xlu1 %1700 }
 0x154   :  { %v1402_v48 = vrot.slane %v1401_v25, 1  ;;  %v1450_v30 = vadd.f32 %v1449_v27, %v1448_v60  ;;  %v1539_v31 = vsel %vm1538_vm10, %v1535_v12, %v1537_v10  ;;  %v1409_v45 = vrot.slane %v1408_v13, 1 }
 0x155   :  { %v1551_v15 = vsel %vm39_vm1, %v1547_v33, 0.0  ;;  %v1540_v55 = vsel %vm1538_vm10, %v2770_v56, %v1535_v12  ;;  %v2804_v50 = vsub.f32 %v1539_v31, %v2567_v62  ;;  %v1561_v52 = vrot.slane %v1560_v43, 2 }
 0x156   :  { %v1602_v54 = vsel %vm39_vm1, %v1588_v29, 0.0  ;;  %v1579_v36 = vand.u32 2147483647, %v1543_v28  ;;  %v2808_v47 = vsub.f32 %v1540_v55, %v2558_v58  ;;  %v2810_v38 = vadd.f32 %v1278_v42, %v1277_v61 }
 0x157   :  { %v2174_v39 = vpop.eup %2173  ;;  %v2812_v10 = vadd.f32 %v1285_v24, %v1284_v23  ;;  %v1438_v7 = vadd.f32 %v1437_v59, %v1436_v35  ;;  %v1431_v8 = vadd.f32 %v1430_v51, %v1429_v40  ;;  %v1461_v16 = vmul.f32 1.442695, %v1456_v46  ;;  %v1699_v46 = vpop.permute.xlu0 %1698 }
 0x158   :  { %v2176_v63 = vpop.eup %2175  ;;  %v1403_v56 = vadd.f32 %v1402_v48, %v1401_v25  ;;  %v1552_v17 = vrot.slane %v1551_v15, 4  ;;  %v1549_v62 = vmul.f32 %v2808_v47, %v2808_v47  ;;  %v1410_v32 = vadd.f32 %v1409_v45, %v1408_v13 }
 0x159   :  { %v1444_v3 = vrot.slane %v1443_v34, 2  ;;  %v1603_v18 = vrot.slane %v1602_v54, 4  ;;  %v1550_v58 = vmul.f32 %v2804_v50, %v2804_v50  ;;  %2179 = vpow2.f32 %v1459_v1 }
 0x15a   :  { %v2178_v19 = vpop.eup %2177  ;;  %v1451_v61 = vrot.slane %v1450_v30, 2  ;;  %v1562_v60 = vadd.f32 %v1561_v52, %v1560_v43  ;;  %v1587_v20 = vrot.slane %v1579_v36, 3  ;;  %v1305_v23 = vcombine.low %v2174_v39, %v2172_v14 }
 0x15b   :  { %v1336_v35 = vcombine.low %v2810_v38, %v2812_v10  ;;  %v1439_v0 = vrot.slane %v1438_v7, 1  ;;  %v1432_v6 = vrot.slane %v1431_v8, 1  ;;  %2181 = vpow2.f32 %v1461_v16 }
 0x15c   :  { %v1457_v40 = vmul.f32 -0.005, %v1403_v56  ;;  %v1553_v4 = vadd.f32 %v1552_v17, %v1551_v15  ;;  %v1565_v28 = vsel %vm39_vm1, %v1549_v62, 0.0  ;;  %v1306_v41 = vcombine.low %v2176_v63, %v2178_v19  ;;  %v1705_v15 = vpop.permute.xlu1 %1704 }
 0x15d   :  { %v1458_v25 = vmul.f32 -0.005, %v1410_v32  ;;  %v1604_v27 = vadd.f32 %v1603_v18, %v1602_v54  ;;  %v1572_v13 = vsel %vm39_vm1, %v1550_v58, 0.0  ;;  %v1445_v33 = vadd.f32 %v1444_v3, %v1443_v34  ;;  %v2855_v58 = vld [vmem:[%s3055_s1] sm:$0x3f] }
 0x15e   :  { %v1452_v12 = vadd.f32 %v1451_v61, %v1450_v30  ;;  %v1563_v14 = vrot.slane %v1562_v60, 1  ;;  %v1595_v42 = vsel %vm39_vm1, %v1587_v20, 0.0  ;;  %v2826_v24 = vrot.slane %v1305_v23, %v2348_v22 }
 0x15f   :  { %v1440_v43 = vadd.f32 %v1439_v0, %v1438_v7  ;;  %v1433_v29 = vadd.f32 %v1432_v6, %v1431_v8  ;;  %v1566_v59 = vrot.slane %v1565_v28, 4  ;;  %v1463_v51 = vmul.f32 1.442695, %v1457_v40  ;;  %v2839_v7 = vld [vmem:[%s3055_s1 + $0x8] sm:$0x3f]  ;;  %v1703_v6 = vpop.permute.xlu0 %1702 }
 0x160   :  { %v1554_v1 = vrot.slane %v1553_v4, 2  ;;  %v1573_v48 = vrot.slane %v1572_v13, 4  ;;  %v2830_v31 = vrot.slane %v1306_v41, %v2348_v22  ;;  %v1465_v34 = vmul.f32 1.442695, %v1458_v25 }
 0x161   :  { %v1605_v30 = vrot.slane %v1604_v27, 2  ;;  %v1596_v45 = vrot.slane %v1595_v42, 4  ;;  %v1446_v55 = vrot.slane %v1445_v33, 1  ;;  %v1453_v52 = vrot.slane %v1452_v12, 1 }
 0x162   :  { %v1564_v54 = vadd.f32 %v1563_v14, %v1562_v60  ;;  %v1709_v36 = vsel %vm1706_vm11, %v1699_v46, %v2820_v53  ;;  %v1503_v39 = vcombine.low %v1433_v29, %v1440_v43  ;;  %v1567_v38 = vadd.f32 %v1566_v59, %v1565_v28 }
 0x163   :  { %v1581_v10 = vand.u32 2147483647, %v2808_v47  ;;  %v2842_v8 = vsub.f32 %v1709_v36, %v2839_v7  ;;  %2183 = vpow2.f32 %v1463_v51  ;;  %v1555_v63 = vadd.f32 %v1554_v1, %v1553_v4 }
 0x164   :  { %v1574_v16 = vadd.f32 %v1573_v48, %v1572_v13  ;;  %v1710_v56 = vsel %vm1706_vm11, %v1705_v15, %v1699_v46  ;;  %2185 = vpow2.f32 %v1465_v34  ;;  %v1606_v17 = vadd.f32 %v1605_v30, %v1604_v27 }
 0x165   :  { %v1597_v62 = vadd.f32 %v1596_v45, %v1595_v42  ;;  %v1716_v47 = vmul.f32 %v2842_v8, %v2842_v8  ;;  %v2848_v32 = vadd.f32 %v1446_v55, %v1445_v33  ;;  %v2850_v3 = vadd.f32 %v1453_v52, %v1452_v12 }
 0x166   :  { %v1624_v18 = vmul.f32 -0.005, %v1564_v54  ;;  %v1711_v19 = vsub.f32 %v1710_v56, %v2855_v58  ;;  %v2858_v61 = vpop.eup %2179  ;;  %v2861_v60 = vrot.slane %v1336_v35, %v2348_v22  ;;  %v1568_v20 = vrot.slane %v1567_v38, 2 }
 0x167   :  { %v1582_v23 = vand.u32 2147483647, %v2804_v50  ;;  %v1589_v0 = vrot.slane %v1581_v10, 3  ;;  %v2867_v4 = vrot.slane %v1503_v39, %v2348_v22  ;;  %v1556_v28 = vrot.slane %v1555_v63, 1 }
 0x168   :  { %v1575_v41 = vrot.slane %v1574_v16, 2  ;;  %v2869_v25 = vpop.eup %2181  ;;  %v1607_v27 = vrot.slane %v1606_v17, 1  ;;  %v1598_v13 = vrot.slane %v1597_v62, 2  ;;  %v1726_v35 = vsel %vm39_vm1, %v1716_v47, 0.0 }
 0x169   :  { %v1715_v33 = vmul.f32 %v1711_v19, %v1711_v19  ;;  %v1473_v50 = vcombine.low %v2858_v61, %v2869_v25  ;;  %v1629_v14 = vmul.f32 1.442695, %v1624_v18  ;;  %v1707_v42 = vsel %vm1706_vm11, %v1703_v6, %v1705_v15  ;;  %v2888_v15 = vld [vmem:[%s3055_s1 + $0x18] sm:$0x3f] }
 0x16a   :  { %v1569_v43 = vadd.f32 %v1568_v20, %v1567_v38  ;;  %v1590_v29 = vrot.slane %v1582_v23, 3  ;;  %v1609_v59 = vsel %vm39_vm1, %v1589_v0, 0.0  ;;  %v1557_v51 = vadd.f32 %v1556_v28, %v1555_v63  ;;  %v2897_v63 = vld [vmem:[%s3055_s1 + $0x10] sm:$0x3f] }
 0x16b   :  { %v1719_v46 = vsel %vm39_vm1, %v1715_v33, 0.0  ;;  %v1576_v1 = vadd.f32 %v1575_v41, %v1574_v16  ;;  %v1727_v48 = vrot.slane %v1726_v35, 4  ;;  %v2880_v30 = vadd.f32 %v1607_v27, %v1606_v17 }
 0x16c   :  { %v1720_v34 = vrot.slane %v1719_v46, 4  ;;  %v1599_v45 = vadd.f32 %v1598_v13, %v1597_v62  ;;  %v1708_v55 = vsel %vm1706_vm11, %v2820_v53, %v1703_v6  ;;  %v2891_v52 = vsub.f32 %v1707_v42, %v2888_v15 }
 0x16d   :  { %2187 = vpow2.f32 %v1629_v14  ;;  %v1610_v54 = vrot.slane %v1609_v59, 4  ;;  %v1747_v39 = vand.u32 2147483647, %v1711_v19  ;;  %v1570_v38 = vrot.slane %v1569_v43, 1 }
 0x16e   :  { %v1721_v36 = vadd.f32 %v1720_v34, %v1719_v46  ;;  %v1616_v10 = vsel %vm39_vm1, %v1590_v29, 0.0  ;;  %v2900_v53 = vsub.f32 %v1708_v55, %v2897_v63  ;;  %v1718_v16 = vmul.f32 %v2891_v52, %v2891_v52 }
 0x16f   :  { %v1623_v56 = vmul.f32 -0.005, %v1557_v51  ;;  %v1577_v17 = vrot.slane %v1576_v1, 1  ;;  %v1728_v62 = vadd.f32 %v1727_v48, %v1726_v35  ;;  %v1600_v19 = vrot.slane %v1599_v45, 1  ;;  %v1869_v51 = vpop.permute.xlu1 %1868  ;;  %v1867_v48 = vpop.permute.xlu0 %1866 }
 0x170   :  { %v1722_v47 = vrot.slane %v1721_v36, 2  ;;  %v2904_v18 = vpop.eup %2183  ;;  %v1748_v20 = vand.u32 2147483647, %v2842_v8  ;;  %v1717_v23 = vmul.f32 %v2900_v53, %v2900_v53  ;;  %v1740_v0 = vsel %vm39_vm1, %v1718_v16, 0.0 }
 0x171   :  { %v2910_v6 = vpop.eup %2185  ;;  %v1611_v28 = vadd.f32 %v1610_v54, %v1609_v59  ;;  %v1617_v41 = vrot.slane %v1616_v10, 4  ;;  %v1755_v27 = vrot.slane %v1747_v39, 3  ;;  %v1571_v13 = vadd.f32 %v1570_v38, %v1569_v43 }
 0x172   :  { %v1723_v35 = vadd.f32 %v1722_v47, %v1721_v36  ;;  %v1733_v33 = vsel %vm39_vm1, %v1717_v23, 0.0  ;;  %v1741_v14 = vrot.slane %v1740_v0, 4  ;;  %v1627_v42 = vmul.f32 1.442695, %v1623_v56 }
 0x173   :  { %v1578_v29 = vadd.f32 %v1577_v17, %v1576_v1  ;;  %v1729_v8 = vrot.slane %v1728_v62, 2  ;;  %v1734_v46 = vrot.slane %v1733_v33, 4  ;;  %v2916_v55 = vadd.f32 %v1600_v19, %v1599_v45  ;;  %v1873_v40 = vpop.permute.xlu1 %1872 }
 0x174   :  { %v1756_v59 = vrot.slane %v1748_v20, 3  ;;  %v1742_v54 = vadd.f32 %v1741_v14, %v1740_v0  ;;  %v1612_v39 = vrot.slane %v1611_v28, 2  ;;  %v1618_v16 = vadd.f32 %v1617_v41, %v1616_v10 }
 0x175   :  { %v1763_v43 = vsel %vm39_vm1, %v1755_v27, 0.0  ;;  %v1735_v36 = vadd.f32 %v1734_v46, %v1733_v33  ;;  %v1625_v38 = vmul.f32 -0.005, %v1571_v13  ;;  %v1724_v47 = vrot.slane %v1723_v35, 1 }
 0x176   :  { %v1743_v56 = vrot.slane %v1742_v54, 2  ;;  %v1877_v1 = vsel %vm1874_vm12, %v1867_v48, %v1869_v51  ;;  %2189 = vpow2.f32 %v1627_v42  ;;  %v1626_v17 = vmul.f32 -0.005, %v1578_v29 }
 0x177   :  { %v1730_v23 = vadd.f32 %v1729_v8, %v1728_v62  ;;  %v1736_v2 = vrot.slane %v1735_v36, 2  ;;  %v1770_v45 = vsel %vm39_vm1, %v1756_v59, 0.0  ;;  %v1764_v19 = vrot.slane %v1763_v43, 4 }
 0x178   :  { %v1744_v20 = vadd.f32 %v1743_v56, %v1742_v54  ;;  %v1880_v0 = vsub.f32 %v1877_v1, %v2839_v7  ;;  %v2923_v10 = vadd.f32 %v1612_v39, %v1611_v28  ;;  %v1619_v41 = vrot.slane %v1618_v16, 2  ;;  %v1871_v1 = vpop.permute.xlu0 %1870 }
 0x179   :  { %v1737_v27 = vadd.f32 %v1736_v2, %v1735_v36  ;;  %v1749_v13 = vand.u32 2147483647, %v2900_v53  ;;  %v1631_v14 = vmul.f32 1.442695, %v1625_v38  ;;  %v1725_v46 = vadd.f32 %v1724_v47, %v1723_v35 }
 0x17a   :  { %v2926_v33 = vpop.eup %2187  ;;  %v1745_v42 = vrot.slane %v1744_v20, 1  ;;  %v1884_v29 = vmul.f32 %v1880_v0, %v1880_v0  ;;  %v1633_v62 = vmul.f32 1.442695, %v1626_v17  ;;  %v1731_v8 = vrot.slane %v1730_v23, 1 }
 0x17b   :  { %v1771_v12 = vrot.slane %v1770_v45, 4  ;;  %v1738_v59 = vrot.slane %v1737_v27, 1  ;;  %v2928_v54 = vadd.f32 %v1764_v19, %v1763_v43  ;;  %v1750_v28 = vand.u32 2147483647, %v2891_v52 }
 0x17c   :  { %v1746_v7 = vadd.f32 %v1745_v42, %v1744_v20  ;;  %v1894_v2 = vsel %vm39_vm1, %v1884_v29, 0.0  ;;  %v1614_v53 = vrot.slane %v2923_v10, 1  ;;  %v2933_v39 = vadd.f32 %v1619_v41, %v1618_v16 }
 0x17d   :  { %v1757_v36 = vrot.slane %v1749_v13, 3  ;;  %v1895_v35 = vrot.slane %v1894_v2, 4  ;;  %2191 = vpow2.f32 %v1631_v14  ;;  %v1791_v38 = vmul.f32 -0.005, %v1725_v46 }
 0x17e   :  { %v1739_v47 = vadd.f32 %v1738_v59, %v1737_v27  ;;  %v1878_v56 = vsel %vm1874_vm12, %v1873_v40, %v1867_v48  ;;  %2193 = vpow2.f32 %v1633_v62  ;;  %v1732_v43 = vadd.f32 %v1731_v8, %v1730_v23 }
 0x17f   :  { %v2937_v17 = vadd.f32 %v1771_v12, %v1770_v45  ;;  %v1896_v52 = vadd.f32 %v1895_v35, %v1894_v2  ;;  %v1766_v19 = vrot.slane %v2928_v54, 2  ;;  %v1758_v20 = vrot.slane %v1750_v28, 3 }
 0x180   :  { %v1794_v42 = vmul.f32 -0.005, %v1746_v7  ;;  %v1879_v16 = vsub.f32 %v1878_v56, %v2855_v58  ;;  %v1777_v41 = vsel %vm39_vm1, %v1757_v36, 0.0  ;;  %v1875_v27 = vsel %vm1874_vm12, %v1871_v1, %v1873_v40 }
 0x181   :  { %v1897_v13 = vrot.slane %v1896_v52, 2  ;;  %v1876_v48 = vsel %vm1874_vm12, %v1869_v51, %v1871_v1  ;;  %v1795_v14 = vmul.f32 1.442695, %v1791_v38  ;;  %v1793_v23 = vmul.f32 -0.005, %v1739_v47 }
 0x182   :  { %v1916_v12 = vand.u32 2147483647, %v1880_v0  ;;  %v1883_v45 = vmul.f32 %v1879_v16, %v1879_v16  ;;  %v1792_v46 = vmul.f32 -0.005, %v1732_v43  ;;  %v1915_v62 = vand.u32 2147483647, %v1879_v16 }
 0x183   :  { %v1898_v29 = vadd.f32 %v1897_v13, %v1896_v52  ;;  %v1881_v8 = vsub.f32 %v1876_v48, %v2897_v63  ;;  %v2947_v59 = vpop.eup %2189  ;;  %v1778_v58 = vrot.slane %v1777_v41, 4  ;;  %v1801_v7 = vmul.f32 1.442695, %v1794_v42 }
 0x184   :  { %v1887_v28 = vsel %vm39_vm1, %v1883_v45, 0.0  ;;  %v1882_v40 = vsub.f32 %v1875_v27, %v2888_v15  ;;  %v1784_v5 = vsel %vm39_vm1, %v1758_v20, 0.0  ;;  %v1923_v2 = vrot.slane %v1915_v62, 3 }
 0x185   :  { %v1888_v51 = vrot.slane %v1887_v28, 4  ;;  %v1885_v36 = vmul.f32 %v1881_v8, %v1881_v8  ;;  %2195 = vpow2.f32 %v1795_v14  ;;  %v1799_v0 = vmul.f32 1.442695, %v1793_v23 }
 0x186   :  { %v1924_v35 = vrot.slane %v1916_v12, 3  ;;  %v1886_v38 = vmul.f32 %v1882_v40, %v1882_v40  ;;  %v1899_v47 = vrot.slane %v1898_v29, 1  ;;  %v1917_v1 = vand.u32 2147483647, %v1881_v8 }
 0x187   :  { %v1889_v56 = vadd.f32 %v1888_v51, %v1887_v28  ;;  %v1901_v63 = vsel %vm39_vm1, %v1885_v36, 0.0  ;;  %v1797_v43 = vmul.f32 1.442695, %v1792_v46  ;;  %v1785_v52 = vrot.slane %v1784_v5, 4 }
 0x188   :  { %2197 = vpow2.f32 %v1801_v7  ;;  %v1902_v42 = vrot.slane %v1901_v63, 4  ;;  %v1931_v15 = vsel %vm39_vm1, %v1923_v2, 0.0  ;;  %v1908_v20 = vsel %vm39_vm1, %v1886_v38, 0.0 }
 0x189   :  { %v1890_v16 = vrot.slane %v1889_v56, 2  ;;  %v1918_v13 = vand.u32 2147483647, %v1882_v40  ;;  %v1779_v27 = vadd.f32 %v1778_v58, %v1777_v41  ;;  %2199 = vpow2.f32 %v1799_v0 }
 0x18a   :  { %v1938_v48 = vsel %vm39_vm1, %v1924_v35, 0.0  ;;  %v1903_v14 = vadd.f32 %v1902_v42, %v1901_v63  ;;  %v2956_v23 = vpop.eup %2191  ;;  %v1900_v12 = vadd.f32 %v1899_v47, %v1898_v29  ;;  %v1909_v62 = vrot.slane %v1908_v20, 4 }
 0x18b   :  { %v1891_v45 = vadd.f32 %v1890_v16, %v1889_v56  ;;  %v1925_v46 = vrot.slane %v1917_v1, 3  ;;  %v2958_v8 = vpop.eup %2193  ;;  %v1786_v7 = vadd.f32 %v1785_v52, %v1784_v5  ;;  %v1932_v28 = vrot.slane %v1931_v15, 4 }
 0x18c   :  { %v1904_v51 = vrot.slane %v1903_v14, 2  ;;  %v1926_v2 = vrot.slane %v1918_v13, 3  ;;  %2201 = vpow2.f32 %v1797_v43  ;;  %v1910_v40 = vadd.f32 %v1909_v62, %v1908_v20 }
 0x18d   :  { %v1892_v36 = vrot.slane %v1891_v45, 1  ;;  %v1945_v41 = vsel %vm39_vm1, %v1925_v46, 0.0  ;;  %v1939_v58 = vrot.slane %v1938_v48, 4  ;;  %v1960_v29 = vmul.f32 -0.005, %v1900_v12 }
 0x18e   :  { %v1905_v0 = vadd.f32 %v1904_v51, %v1903_v14  ;;  %v1946_v35 = vrot.slane %v1945_v41, 4  ;;  %v1952_v38 = vsel %vm39_vm1, %v1926_v2, 0.0  ;;  %v1911_v56 = vrot.slane %v1910_v40, 2 }
 0x18f   :  { %v1893_v47 = vadd.f32 %v1892_v36, %v1891_v45  ;;  %v1953_v63 = vrot.slane %v1952_v38, 4  ;;  %v1780_v1 = vrot.slane %v1779_v27, 2  ;;  %v1787_v42 = vrot.slane %v1786_v7, 2 }
 0x190   :  { %v1933_v5 = vadd.f32 %v1932_v28, %v1931_v15  ;;  %v1906_v52 = vrot.slane %v1905_v0, 1  ;;  %v1912_v13 = vadd.f32 %v1911_v56, %v1910_v40  ;;  %v1947_v43 = vadd.f32 %v1946_v35, %v1945_v41 }
 0x191   :  { %v1959_v16 = vmul.f32 -0.005, %v1893_v47  ;;  %v1954_v34 = vadd.f32 %v1953_v63, %v1952_v38  ;;  %v2965_v20 = vadd.f32 %v1614_v53, %v2923_v10  ;;  %v1773_v14 = vrot.slane %v2937_v17, 2 }
 0x192   :  { %v1940_v62 = vadd.f32 %v1939_v58, %v1938_v48  ;;  %v1907_v12 = vadd.f32 %v1906_v52, %v1905_v0  ;;  %v2196_v45 = vpop.eup %2195  ;;  %v1767_v46 = vadd.f32 %v1766_v19, %v2928_v54  ;;  %v1965_v15 = vmul.f32 1.442695, %v1960_v29 }
 0x193   :  { %v1963_v28 = vmul.f32 1.442695, %v1959_v16  ;;  %v1913_v51 = vrot.slane %v1912_v13, 1  ;;  %v1781_v2 = vadd.f32 %v1780_v1, %v1779_v27  ;;  %v1788_v36 = vadd.f32 %v1787_v42, %v1786_v7 }
 0x194   :  { %v1934_v40 = vrot.slane %v1933_v5, 2  ;;  %v1961_v41 = vmul.f32 -0.005, %v1907_v12  ;;  %v1948_v53 = vrot.slane %v1947_v43, 2  ;;  %v1955_v38 = vrot.slane %v1954_v34, 2 }
 0x195   :  { %v2198_v35 = vpop.eup %2197  ;;  %2203 = vpow2.f32 %v1963_v28  ;;  %v1914_v10 = vadd.f32 %v1913_v51, %v1912_v13  ;;  %v1621_v48 = vrot.slane %v2933_v39, 1  ;;  %v1774_v58 = vadd.f32 %v1773_v14, %v2937_v17 }
 0x196   :  { %v1941_v0 = vrot.slane %v1940_v62, 2  ;;  %v1967_v47 = vmul.f32 1.442695, %v1961_v41  ;;  %v2200_v56 = vpop.eup %2199  ;;  %v1641_v54 = vcombine.low %v2947_v59, %v2926_v33  ;;  %v1768_v19 = vrot.slane %v1767_v46, 1 }
 0x197   :  { %2205 = vpow2.f32 %v1965_v15  ;;  %v1962_v27 = vmul.f32 -0.005, %v1914_v10  ;;  %v1642_v7 = vcombine.low %v2956_v23, %v2958_v8  ;;  %v1782_v29 = vrot.slane %v1781_v2, 1 }
 0x198   :  { %v1789_v63 = vrot.slane %v1788_v36, 1  ;;  %v1935_v1 = vadd.f32 %v1934_v40, %v1933_v5  ;;  %v1949_v42 = vadd.f32 %v1948_v53, %v1947_v43  ;;  %v1956_v52 = vadd.f32 %v1955_v38, %v1954_v34 }
 0x199   :  { %2207 = vpow2.f32 %v1967_v47  ;;  %v1969_v16 = vmul.f32 1.442695, %v1962_v27  ;;  %v2202_v17 = vpop.eup %2201  ;;  %v1622_v13 = vadd.f32 %v1621_v48, %v2933_v39  ;;  %v1775_v14 = vrot.slane %v1774_v58, 1 }
 0x19a   :  { %v1942_v12 = vadd.f32 %v1941_v0, %v1940_v62  ;;  %v1481_v33 = vrot.slane %v1473_v50, %v2348_v22  ;;  %v3057_v59 = vcombine.low %v2904_v18, %v2910_v6  ;;  %v1809_v8 = vcombine.low %v2196_v45, %v2202_v17  ;;  %v2093_v45 = vld [vmem:[%s3054_s0 + $0x6] ss:$8 sm:$0xf] }
 0x19b   :  { %2209 = vpow2.f32 %v1969_v16  ;;  %v1810_v34 = vcombine.low %v2200_v56, %v2198_v35  ;;  %v1769_v5 = vadd.f32 %v1768_v19, %v1767_v46  ;;  %v1783_v43 = vadd.f32 %v1782_v29, %v1781_v2  ;;  %v2094_v46 = vld [vmem:[%s3054_s0 + $0x7] ss:$8 sm:$0xf] }
 0x19c   :  { %v1488_v23 = vrot.slane %v3057_v59, %v2348_v22  ;;  %v1790_v15 = vadd.f32 %v1789_v63, %v1788_v36  ;;  %v1936_v28 = vrot.slane %v1935_v1, 1  ;;  %v1950_v39 = vrot.slane %v1949_v42, 1 }
 0x19d   :  { %v1957_v51 = vrot.slane %v1956_v52, 1  ;;  %v1649_v62 = vrot.slane %v1641_v54, %v2348_v22  ;;  %v1656_v40 = vrot.slane %v1642_v7, %v2348_v22  ;;  %v3058_v61 = vcombine.low %v2826_v24, %v2830_v31 }
 0x19e   :  { %v1671_v50 = vcombine.low %v2916_v55, %v2880_v30  ;;  %v1776_v18 = vadd.f32 %v1775_v14, %v1774_v58  ;;  %v1943_v6 = vrot.slane %v1942_v12, 1  ;;  %v1672_v2 = vcombine.low %v2965_v20, %v1622_v13  ;;  %v2096_v13 = vld [vmem:[%s3054_s0 + $0x21] ss:$8 sm:$0xf] }
 0x19f   :  { %v1328_v25 = vrot.slane %v3058_v61, %v2348_v22  ;;  %v1489_v36 = vcombine.low %v1481_v33, %v1488_v23  ;;  %v1817_v41 = vrot.slane %v1809_v8, %v2348_v22  ;;  %v1824_v24 = vrot.slane %v1810_v34, %v2348_v22 }
 0x1a0   :  { %v3059_v31 = vcombine.low %v2848_v32, %v2850_v3  ;;  %v1839_v55 = vcombine.low %v1769_v5, %v1776_v18  ;;  %v1840_v35 = vcombine.low %v1783_v43, %v1790_v15  ;;  %v1937_v10 = vadd.f32 %v1936_v28, %v1935_v1  ;;  %v2097_v5 = vld [vmem:[%s3054_s0 + $0x22] ss:$8 sm:$0xf] }
 0x1a1   :  { %v3060_v53 = vcombine.low %v2738_v9, %v2759_v21  ;;  %v1951_v48 = vadd.f32 %v1950_v39, %v1949_v42  ;;  %v1958_v20 = vadd.f32 %v1957_v51, %v1956_v52  ;;  %v1657_v58 = vcombine.low %v1649_v62, %v1656_v40 }
 0x1a2   :  { %v1518_v30 = vrot.slane %v3059_v31, %v2348_v22  ;;  %v2204_v0 = vpop.eup %2203  ;;  %v1162_v47 = vmul.f32 %v2093_v45, %v2792_v57  ;;  %v1330_v56 = vmul.f32 %v2094_v46, %v1328_v25  ;;  %v1351_v54 = vcombine.low %v2795_v37, %v2861_v60  ;;  %v2095_v37 = vld [vmem:[%s3054_s0 + $0x20] ss:$8 sm:$0xf]  ;;  %v2098_v46 = vld [vmem:[%s3054_s0 + $0x23] ss:$8 sm:$0xf] }
 0x1a3   :  { %v1190_v38 = vrot.slane %v3060_v53, %v2348_v22  ;;  %v1944_v32 = vadd.f32 %v1943_v6, %v1942_v12  ;;  %v1679_v3 = vrot.slane %v1671_v50, %v2348_v22  ;;  %v1686_v19 = vrot.slane %v1672_v2, %v2348_v22  ;;  %s2254_s0 = smov [#allocation2]  }
 0x1a4   :  { %v1496_v27 = vrot.slane %v1489_v36, %v2348_v22  ;;  %v1825_v7 = vcombine.low %v1817_v41, %v1824_v24  ;;  %v2206_v9 = vpop.eup %2205  ;;  %v1519_v21 = vcombine.low %v2867_v4, %v1518_v30  ;;  %v1847_v29 = vrot.slane %v1839_v55, %v2348_v22  ;;  %s2080_s12 = sshll.u32 %s2254_s0, 4  ;;  %s2081_s12 = int_to_ptr.vmem [resolvable:$true] %s2080_s12 }
 0x1a5   :  { %v1854_v63 = vrot.slane %v1840_v35, %v2348_v22  ;;  %v2007_v57 = vcombine.low %v1937_v10, %v1944_v32  ;;  %v857_v60 = vadd.f32 %v2729_v44, %v2633_v49  ;;  %v2008_v1 = vcombine.low %v1951_v48, %v1958_v20  ;;  %s2219_s14 = scalar_lea.vmem %s2081_s12, 16  ;;  %s2223_s15 = scalar_lea.vmem %s2081_s12, 32 }
 0x1a6   :  { %v1664_v42 = vrot.slane %v1657_v58, %v2348_v22  ;;  %v1977_v52 = vcombine.low %v2204_v0, %v2206_v9  ;;  %v2208_v16 = vpop.eup %2207  ;;  %v1192_v17 = vmul.f32 %v1190_v38, %v1162_v47  ;;  %v1358_v4 = vrot.slane %v1351_v54, %v2348_v22  ;;  %p2220_p0 = scmp.ne.s32.totalorder %s2081_s12, %s2219_s14  ;;  %p2224_p1 = scmp.lt.s32.totalorder %s2081_s12, %s2081_s12 }
 0x1a7   :  { %v1025_v14 = vadd.f32 %v2740_v26, %v857_v60  ;;  %v1687_v12 = vcombine.low %v1679_v3, %v1686_v19  ;;  %v1498_v33 = vmul.f32 %v2095_v37, %v1496_v27  ;;  %v1832_v59 = vrot.slane %v1825_v7, %v2348_v22  ;;  %p2225_p2 = scmp.lt.s32.totalorder %s2223_s15, %s2219_s14 }
 0x1a8   :  { %v2210_v23 = vpop.eup %2209  ;;  %v1360_v49 = vmul.f32 %v1358_v4, %v1330_v56  ;;  %v1526_v44 = vrot.slane %v1519_v21, %v2348_v22  ;;  %v1855_v8 = vcombine.low %v1847_v29, %v1854_v63  ;;  %v2015_v34 = vrot.slane %v2007_v57, %v2348_v22 }
 0x1a9   :  { %v2022_v43 = vrot.slane %v2008_v1, %v2348_v22  ;;  %v1666_v15 = vmul.f32 %v2096_v13, %v1664_v42  ;;  %v1978_v28 = vcombine.low %v2208_v16, %v2210_v23  ;;  %v1985_v26 = vrot.slane %v1977_v52, %v2348_v22  ;;  %p2226_p3 = por %p2225_p2, %p2224_p1 }
 0x1aa   :  { %v1193_v39 = vadd.f32 %v1192_v17, %v1025_v14  ;;  %v1694_v51 = vrot.slane %v1687_v12, %v2348_v22  ;;  %v1528_v62 = vmul.f32 %v1526_v44, %v1498_v33  ;;  %v1834_v40 = vmul.f32 %v2097_v5, %v1832_v59 }
 0x1ab   :  { %v1992_v61 = vrot.slane %v1978_v28, %v2348_v22  ;;  %v2023_v50 = vcombine.low %v2015_v34, %v2022_v43  ;;  %v1862_v6 = vrot.slane %v1855_v8, %v2348_v22  ;;  %v2037_v55 = vsub.s32 0, %v2341_v11  ;;  %p2227_p4 = pnand %p2226_p3, %p2220_p0 }
 0x1ac   :  { %v1361_v25 = vadd.f32 %v1360_v49, %v1193_v39  ;;  %v1696_v18 = vmul.f32 %v1694_v51, %v1666_v15  ;;  %v2041_v53 = vsub.s32 1, %v2341_v11  ;;  %v2045_v38 = vsub.s32 2, %v2341_v11 }
 0x1ad   :  { %v1993_v45 = vcombine.low %v1985_v26, %v1992_v61  ;;  %v1864_v36 = vmul.f32 %v1862_v6, %v1834_v40  ;;  %v2030_v30 = vrot.slane %v2023_v50, %v2348_v22  ;;  %v2049_v20 = vsub.s32 3, %v2341_v11 }
 0x1ae   :  { %v1529_v2 = vadd.f32 %v1528_v62, %v1361_v25 }
 0x1af   :  { %v2000_v41 = vrot.slane %v1993_v45, %v2348_v22 }
 0x1b0   :  { %v1697_v24 = vadd.f32 %v1696_v18, %v1529_v2 }
 0x1b1   :  { %v2002_v31 = vmul.f32 %v2098_v46, %v2000_v41 }
 0x1b2   :  { %v1865_v35 = vadd.f32 %v1864_v36, %v1697_v24 }
 0x1b3   :  { %v2032_v10 = vmul.f32 %v2030_v30, %v2002_v31 }
 0x1b5   :  { %v2033_v48 = vadd.f32 %v2032_v10, %v1865_v35 }
 0x1b7   :  { %v2038_v58 = vrot.slane %v2033_v48, %v2037_v55  ;;  %v2042_v0 = vrot.slane %v2033_v48, %v2041_v53  ;;  %v2046_v47 = vrot.slane %v2033_v48, %v2045_v38  ;;  %v2050_v56 = vrot.slane %v2033_v48, %v2049_v20 }
 0x1b9   :  { %v2056_v54 = vsel %vm2055_vm13, %v2038_v58, 0.0  ;;  %v2057_v32 = vsel %vm2055_vm13, %v2042_v0, 0.0  ;;  %v2059_v22 = vsel %vm2055_vm13, %v2046_v47, 0.0  ;;  %v2061_v27 = vsel %vm2055_vm13, %v2050_v56, 0.0 }
 0x1ba   :  { %v2058_v3 = vadd.f32 %v2057_v32, %v2056_v54 }
 0x1bc   :  { %v2060_v19 = vadd.f32 %v2059_v22, %v2058_v3 }
 0x1be   :  { %v2062_v7 = vadd.f32 %v2061_v27, %v2060_v19 }
 0x1c0   :  { %2063 = vadd.xlane.f32.xlu0 %v2062_v7 }
 0x249   :  { %v2064_v9 = vpop.xlane.xlu0 %2063 }
 0x24a   :  { %v2065_v21 = vrot.slane %v2064_v9, 4 }
 0x24c   :  { %v2066_v29 = vadd.f32 %v2065_v21, %v2064_v9 }
 0x24e   :  { %v2067_v63 = vrot.slane %v2066_v29, 2 }
 0x250   :  { %v2068_v57 = vadd.f32 %v2067_v63, %v2066_v29 }
 0x252   :  { %v2069_v37 = vrot.slane %v2068_v57, 1 }
 0x254   :  { %v2070_v11 = vadd.f32 %v2069_v37, %v2068_v57 }
 0x256   :  { %2099 = vpush %v2070_v11 }
 0x287   :  { %s2100_s13 = spop %2099 }
 0x288   :  { %v2072_v60 = vstv %s2100_s13 }
 0x289   :  { %2073 = vst [vmem:[#allocation2] sm:$0x1] %v2072_v60 }
 0x28a   :  { %2230 = shalt.err (!%p2227_p4)
}
 0x28b   :  { %2083 = dma.vmem_to_hbm [thread:$0]  %s2081_s12, 16, %s3056_s2, [#allocation3]  }
 0x28c   :  { %2239 = dma.done.wait [#allocation3], 16  }
 0x28d   :  { %2240 = vsyncadd [#allocation3], 4294967280 }
 0x28e   :  { %2087 = vsyncpa [#allocation3], 1 }

</bundles_post_ra>
